<compile_context>
chip_gen: v7x
topology: tpu7x:2x2x1
jax: 0.10.0
libtpu: 0.0.40
codegen_flags: <defaults>
</compile_context>

<pallas_src>
import math

import jax
import jax.numpy as jnp
import numpy as np
from jax import lax
from jax.experimental import pallas as pl
from jax.experimental.pallas import tpu as pltpu

_VMEM_LIMIT = 32 * 1024 * 1024  # stay inside v7x's scoped-VMEM default


# ---------------- pass 1: element-wise MLP + per-tile partial segment max ----
def elt1_kernel(csr_ref, x_ref, w0_ref, b0_ref, w1_ref, b1_ref, h_ref, pmax_ref):
    i = pl.program_id(0)
    tm = x_ref.shape[0]
    n_groups = pmax_ref.shape[1]

    # mlp_elt_1: Linear -> folded-BN shift -> ReLU, twice (MXU default precision)
    z = jnp.dot(x_ref[...], w0_ref[...], preferred_element_type=jnp.float32)
    z = jnp.maximum(z + b0_ref[...], 0.0)
    h = jnp.dot(z, w1_ref[...], preferred_element_type=jnp.float32)
    h = jnp.maximum(h + b1_ref[...], 0.0)                      # [tm, D], >= 0
    h_ref[...] = h.astype(h_ref.dtype)                         # bf16 intermediate

    # partial segment_csr(h, csr, reduce='max') for this tile's rows.
    # 0.0 is a valid identity because h is post-ReLU; it also keeps groups that
    # are empty (globally or within this tile) finite -> no -inf/NaN hazard.
    row = i * tm + lax.broadcasted_iota(jnp.int32, (tm, 1), 0)  # global row ids
    # TODO(synk): the group loop is unrolled (static G); for very large numbers
    # of CSR groups the group axis should be tiled as well.
    for g in range(n_groups):
        member = jnp.logical_and(row >= csr_ref[g], row < csr_ref[g + 1])  # [tm,1]
        pmax_ref[0, g:g + 1, :] = jnp.max(
            jnp.where(member, h, 0.0), axis=0, keepdims=True)


# ---------------- pass 2: reduce partial maxes + set-level MLP (tiny) ---------
def set_kernel(pmax_ref, w2_ref, b2_ref, w3_ref, b3_ref, s_ref):
    x_set = jnp.max(pmax_ref[...], axis=0)                      # [G, D]
    z = jnp.dot(x_set, w2_ref[...], preferred_element_type=jnp.float32)
    z = jnp.maximum(z + b2_ref[...], 0.0)
    z = jnp.dot(z, w3_ref[...], preferred_element_type=jnp.float32)
    s_ref[...] = jnp.maximum(z + b3_ref[...], 0.0)


# ---------------- pass 3: gather_csr (one-hot matmul) + fusion + elt MLP 2 ----
def elt2_kernel(lo_ref, hi_ref, h_ref, s_ref, w4a_ref, w4b_ref, b4_ref,
                w5_ref, b5_ref, o_ref):
    i = pl.program_id(0)
    tm = h_ref.shape[0]

    # gather_csr: each row belongs to exactly one contiguous CSR group, so the
    # redistribution is a one-hot [tm, G] matmul against s (runs on the MXU).
    row = i * tm + lax.broadcasted_iota(jnp.int32, (tm, 1), 0)       # [tm, 1]
    onehot = jnp.logical_and(row >= lo_ref[...], row < hi_ref[...])  # [tm, G]
    gathered = jnp.dot(onehot.astype(jnp.float32), s_ref[...],
                       preferred_element_type=jnp.float32)           # [tm, D]

    # fusion='concatenation' folded into split weights:
    #   concat([h, gathered], -1) @ W4  ==  h @ W4a + gathered @ W4b
    h = h_ref[...].astype(jnp.float32)
    z = jnp.dot(h, w4a_ref[...], preferred_element_type=jnp.float32)
    z = z + jnp.dot(gathered, w4b_ref[...], preferred_element_type=jnp.float32)
    z = jnp.maximum(z + b4_ref[...], 0.0)
    z = jnp.dot(z, w5_ref[...], preferred_element_type=jnp.float32)
    o_ref[...] = jnp.maximum(z + b5_ref[...], 0.0)

    # TODO(synk): use_num=True (extra sqrt(1/(group_size+1e-3)) set feature),
    # pool modes mean/min/sum and fusion modes residual/both are not emitted
    # since the module defaults disable them.


# ------------------------------- wrapper --------------------------------------
def _full_spec(shape):
    nd = len(shape)
    return pl.BlockSpec(shape, lambda *_, _nd=nd: (0,) * _nd)


def deepset_feat_forward(x, csr_idx, params, *, tile_m=128):
    """params: 6 (w_folded[in,out], shift[1,out]) pairs; BN scale already folded
    into the weights.  csr_idx: int32 [G+1], contiguous groups covering [0, N)."""
    n, d_in = x.shape
    d = params[1][0].shape[1]
    g = int(csr_idx.shape[0]) - 1

    (w0, b0), (w1, b1), (w2, b2), (w3, b3), (w4, b4), (w5, b5) = params
    w4a, w4b = w4[:d], w4[d:]            # split weight replaces the feature concat

    # Pad rows to a tile multiple; padded rows fall outside every CSR group and
    # are sliced off at the end.
    pad = (-n) % tile_m
    if pad:
        x = jnp.pad(x, ((0, pad), (0, 0)))
    n_pad = n + pad
    n_tiles = n_pad // tile_m

    csr = csr_idx.astype(jnp.int32)
    csr_lo = csr[:-1].reshape(1, g)
    csr_hi = csr[1:].reshape(1, g)

    parallel = pltpu.CompilerParams(dimension_semantics=("parallel",),
                                    vmem_limit_bytes=_VMEM_LIMIT)

    # ---- pass 1: element MLP + per-tile partial group maxes ------------------
    h, pmax = pl.pallas_call(
        elt1_kernel,
        out_shape=(jax.ShapeDtypeStruct((n_pad, d), jnp.bfloat16),
                   jax.ShapeDtypeStruct((n_tiles, g, d), jnp.float32)),
        grid_spec=pltpu.PrefetchScalarGridSpec(
            num_scalar_prefetch=1,
            grid=(n_tiles,),
            in_specs=[
                pl.BlockSpec((tile_m, d_in), lambda i, c: (i, 0)),
                pl.BlockSpec((d_in, d), lambda i, c: (0, 0)),
                pl.BlockSpec((1, d), lambda i, c: (0, 0)),
                pl.BlockSpec((d, d), lambda i, c: (0, 0)),
                pl.BlockSpec((1, d), lambda i, c: (0, 0)),
            ],
            out_specs=(
                pl.BlockSpec((tile_m, d), lambda i, c: (i, 0)),
                pl.BlockSpec((1, g, d), lambda i, c: (i, 0, 0)),
            )),
        compiler_params=parallel,
    )(csr, x, w0, b0, w1, b1)

    # ---- pass 2: reduce over tiles + set MLP (tiny, single block) ------------
    s = pl.pallas_call(
        set_kernel,
        out_shape=jax.ShapeDtypeStruct((g, d), jnp.float32),
        grid=(1,),
        in_specs=[_full_spec((n_tiles, g, d)), _full_spec((d, d)), _full_spec((1, d)),
                  _full_spec((d, d)), _full_spec((1, d))],
        out_specs=_full_spec((g, d)),
        compiler_params=pltpu.CompilerParams(dimension_semantics=("arbitrary",),
                                             vmem_limit_bytes=_VMEM_LIMIT),
    )(pmax, w2, b2, w3, b3)

    # ---- pass 3: gather (one-hot matmul) + fusion + element MLP 2 -------------
    out = pl.pallas_call(
        elt2_kernel,
        out_shape=jax.ShapeDtypeStruct((n_pad, d), jnp.float32),
        grid=(n_tiles,),
        in_specs=[
            pl.BlockSpec((1, g), lambda i: (0, 0)),
            pl.BlockSpec((1, g), lambda i: (0, 0)),
            pl.BlockSpec((tile_m, d), lambda i: (i, 0)),
            pl.BlockSpec((g, d), lambda i: (0, 0)),
            pl.BlockSpec((d, d), lambda i: (0, 0)),
            pl.BlockSpec((d, d), lambda i: (0, 0)),
            pl.BlockSpec((1, d), lambda i: (0, 0)),
            pl.BlockSpec((d, d), lambda i: (0, 0)),
            pl.BlockSpec((1, d), lambda i: (0, 0)),
        ],
        out_specs=pl.BlockSpec((tile_m, d), lambda i: (i, 0)),
        compiler_params=parallel,
    )(csr_lo, csr_hi, h, s, w4a, w4b, b4, w5, b5)

    return out[:n]


# ----------------------------- parameter setup --------------------------------
def make_layer(key, d_in, d_out):
    """Linear(d_in, d_out, bias=False) + BatchNorm1d(d_out) in eval mode, folded
    host-side so the kernel computes  y = x @ (w * bn_scale) + bn_shift."""
    k1, k2, k3, k4, k5 = jax.random.split(key, 5)
    w = jax.random.normal(k1, (d_in, d_out), jnp.float32) * (1.0 / math.sqrt(d_in))
    gamma = 1.0 + 0.1 * jax.random.normal(k2, (1, d_out), jnp.float32)
    beta = 0.1 * jax.random.normal(k3, (1, d_out), jnp.float32)
    run_mean = 0.05 * jax.random.normal(k4, (1, d_out), jnp.float32)
    run_var = 0.9 + 0.1 * jnp.abs(jax.random.normal(k5, (1, d_out), jnp.float32))
    scale = gamma / jnp.sqrt(run_var + 1e-5)
    shift = beta - run_mean * scale
    return (w * scale).astype(jnp.float32), shift.astype(jnp.float32)


# ----------------------------- pure-JAX reference -----------------------------
def ref_forward(x, csr_np, params):
    def mlp(z, layers):
        for w, b in layers:
            z = jnp.maximum(jnp.dot(z, w, preferred_element_type=jnp.float32) + b, 0.0)
        return z

    h = mlp(x, params[0:2])
    g = len(csr_np) - 1
    gid = jnp.asarray(np.repeat(np.arange(g), np.diff(csr_np)))
    x_set = jax.ops.segment_max(h, gid, num_segments=g)
    s = mlp(x_set, params[2:4])
    gathered = s[gid]
    fused = jnp.concatenate([h, gathered], axis=-1)
    return mlp(fused, params[4:6])


if __name__ == "__main__":
    d_in, d_out = 16, 128            # d_out = 128 keeps every lane dimension dense
    n, g = 512, 8
    csr_np = np.array([0, 40, 96, 180, 256, 300, 380, 450, 512], dtype=np.int32)
    assert csr_np[-1] == n and len(csr_np) == g + 1
    csr = jnp.asarray(csr_np)

    key = jax.random.PRNGKey(0)
    kx, kp = jax.random.split(key)
    x = jax.random.normal(kx, (n, d_in), jnp.float32)

    # mlp_elt_1: [d_in, d, d]; mlp_set: [d*len(pool), d, d]; mlp_elt_2: [2d, d, d]
    dims = [(d_in, d_out), (d_out, d_out),
            (d_out, d_out), (d_out, d_out),
            (2 * d_out, d_out), (d_out, d_out)]
    params = [make_layer(k, di, do)
              for k, (di, do) in zip(jax.random.split(kp, len(dims)), dims)]

    out = jax.block_until_ready(deepset_feat_forward(x, csr, params, tile_m=128))
    ref = jax.block_until_ready(ref_forward(x, csr_np, params))

    # Tolerance covers the MXU default (bf16-operand) matmuls and the bf16 h
    # intermediate used in place of HIGHEST-precision f32.
    np.testing.assert_allclose(np.asarray(out), np.asarray(ref), rtol=2e-2, atol=2e-2)
    print("KERNEL_OK")
</pallas_src>

<mosaic_0001>
module attributes {stable_mosaic.version = 11 : i64} {
  func.func @elt1_kernel(%arg0: i32, %arg1: memref<9xi32, #tpu.memory_space<smem>>, %arg2: memref<128x16xf32, #tpu.memory_space<vmem>>, %arg3: memref<16x128xf32, #tpu.memory_space<vmem>>, %arg4: memref<1x128xf32, #tpu.memory_space<vmem>>, %arg5: memref<128x128xf32, #tpu.memory_space<vmem>>, %arg6: memref<1x128xf32, #tpu.memory_space<vmem>>, %arg7: memref<128x128xbf16, #tpu.memory_space<vmem>>, %arg8: memref<1x8x128xf32, #tpu.memory_space<vmem>>) attributes {dimension_semantics = [#tpu.dimension_semantics<parallel>], iteration_bounds = array<i64: 4>, scalar_prefetch = 1 : i64, scratch_operands = 0 : i64, tpu.core_type = #tpu.core_type<tc>, window_params = [{transform_indices = @transform_0, window_bounds = array<i64: 128, 16>}, {pipeline_mode = #tpu.pipeline_mode<synchronous>, transform_indices = @transform_1, window_bounds = array<i64: 16, 128>}, {pipeline_mode = #tpu.pipeline_mode<synchronous>, transform_indices = @transform_2, window_bounds = array<i64: 1, 128>}, {pipeline_mode = #tpu.pipeline_mode<synchronous>, transform_indices = @transform_3, window_bounds = array<i64: 128, 128>}, {pipeline_mode = #tpu.pipeline_mode<synchronous>, transform_indices = @transform_4, window_bounds = array<i64: 1, 128>}, {transform_indices = @transform_5, window_bounds = array<i64: 128, 128>}, {transform_indices = @transform_6, window_bounds = array<i64: 1, 8, 128>}]} {
    %c0 = arith.constant 0 : index
    %c0_0 = arith.constant 0 : index
    %0 = vector.load %arg2[%c0, %c0_0] : memref<128x16xf32, #tpu.memory_space<vmem>>, vector<128x16xf32>
    %c0_1 = arith.constant 0 : index
    %c0_2 = arith.constant 0 : index
    %1 = vector.load %arg3[%c0_1, %c0_2] : memref<16x128xf32, #tpu.memory_space<vmem>>, vector<16x128xf32>
    %cst = arith.constant dense<0.000000e+00> : vector<128x128xf32>
    %2 = tpu.matmul %0, %1, %cst {dimension_numbers = #tpu.dot_dimension_numbers<[1], [0], [0], [1], [0, 0, 1, 1], [], []>} : vector<128x16xf32>, vector<16x128xf32>, vector<128x128xf32> -> vector<128x128xf32>
    %c0_3 = arith.constant 0 : index
    %c0_4 = arith.constant 0 : index
    %3 = vector.load %arg4[%c0_3, %c0_4] : memref<1x128xf32, #tpu.memory_space<vmem>>, vector<1x128xf32>
    %4 = vector.broadcast %3 : vector<1x128xf32> to vector<128x128xf32>
    %5 = arith.addf %2, %4 : vector<128x128xf32>
    %cst_5 = arith.constant 0.000000e+00 : f32
    %6 = vector.broadcast %cst_5 : f32 to vector<128x128xf32>
    %7 = arith.maximumf %5, %6 : vector<128x128xf32>
    %c0_6 = arith.constant 0 : index
    %c0_7 = arith.constant 0 : index
    %8 = vector.load %arg5[%c0_6, %c0_7] : memref<128x128xf32, #tpu.memory_space<vmem>>, vector<128x128xf32>
    %cst_8 = arith.constant dense<0.000000e+00> : vector<128x128xf32>
    %9 = tpu.matmul %7, %8, %cst_8 {dimension_numbers = #tpu.dot_dimension_numbers<[1], [0], [0], [1], [0, 0, 1, 1], [], []>} : vector<128x128xf32>, vector<128x128xf32>, vector<128x128xf32> -> vector<128x128xf32>
    %c0_9 = arith.constant 0 : index
    %c0_10 = arith.constant 0 : index
    %10 = vector.load %arg6[%c0_9, %c0_10] : memref<1x128xf32, #tpu.memory_space<vmem>>, vector<1x128xf32>
    %11 = vector.broadcast %10 : vector<1x128xf32> to vector<128x128xf32>
    %12 = arith.addf %9, %11 : vector<128x128xf32>
    %cst_11 = arith.constant 0.000000e+00 : f32
    %13 = vector.broadcast %cst_11 : f32 to vector<128x128xf32>
    %14 = arith.maximumf %12, %13 : vector<128x128xf32>
    %15 = arith.truncf %14 : vector<128x128xf32> to vector<128x128xbf16>
    %c0_12 = arith.constant 0 : index
    %c0_13 = arith.constant 0 : index
    %16 = vector.load %arg7[%c0_12, %c0_13] : memref<128x128xbf16, #tpu.memory_space<vmem>>, vector<128x128xbf16>
    tpu.vector_store %arg7[%c0_12, %c0_13], %15 {strides = array<i32>} : memref<128x128xbf16, #tpu.memory_space<vmem>>, vector<128x128xbf16>,
    %c128_i32 = arith.constant 128 : i32
    %17 = arith.muli %arg0, %c128_i32 : i32
    %18 = tpu.iota {dimensions = array<i32: 0>} : vector<128x1xi32>
    %19 = vector.broadcast %17 : i32 to vector<128x1xi32>
    %20 = arith.addi %19, %18 : vector<128x1xi32>
    %c0_14 = arith.constant 0 : index
    %21 = memref.load %arg1[%c0_14] : memref<9xi32, #tpu.memory_space<smem>>
    %22 = vector.broadcast %21 : i32 to vector<128x1xi32>
    %23 = arith.cmpi sge, %20, %22 : vector<128x1xi32>
    %c1 = arith.constant 1 : index
    %24 = memref.load %arg1[%c1] : memref<9xi32, #tpu.memory_space<smem>>
    %25 = vector.broadcast %24 : i32 to vector<128x1xi32>
    %26 = arith.cmpi slt, %20, %25 : vector<128x1xi32>
    %27 = arith.andi %23, %26 : vector<128x1xi1>
    %cst_15 = arith.constant 0.000000e+00 : f32
    %28 = vector.shape_cast %27 : vector<128x1xi1> to vector<128x1xi1>
    %29 = vector.broadcast %28 : vector<128x1xi1> to vector<128x128xi1>
    %30 = vector.broadcast %cst_15 : f32 to vector<128x128xf32>
    %31 = arith.select %29, %14, %30 : vector<128x128xi1>, vector<128x128xf32>
    %cst_16 = arith.constant dense<0xFF800000> : vector<128xf32>
    %32 = vector.multi_reduction <maximumf>, %31, %cst_16 [0] : vector<128x128xf32> to vector<128xf32>
    %33 = vector.shape_cast %32 : vector<128xf32> to vector<1x128xf32>
    %c0_17 = arith.constant 0 : index
    %c0_18 = arith.constant 0 : index
    %c0_19 = arith.constant 0 : index
    %34 = vector.load %arg8[%c0_17, %c0_18, %c0_19] : memref<1x8x128xf32, #tpu.memory_space<vmem>>, vector<1x1x128xf32>
    %35 = vector.shape_cast %34 : vector<1x1x128xf32> to vector<1x128xf32>
    %36 = vector.shape_cast %33 : vector<1x128xf32> to vector<1x1x128xf32>
    tpu.vector_store %arg8[%c0_17, %c0_18, %c0_19], %36 {strides = array<i32>} : memref<1x8x128xf32, #tpu.memory_space<vmem>>, vector<1x1x128xf32>,
    %c1_20 = arith.constant 1 : index
    %37 = memref.load %arg1[%c1_20] : memref<9xi32, #tpu.memory_space<smem>>
    %38 = vector.broadcast %37 : i32 to vector<128x1xi32>
    %39 = arith.cmpi sge, %20, %38 : vector<128x1xi32>
    %c2 = arith.constant 2 : index
    %40 = memref.load %arg1[%c2] : memref<9xi32, #tpu.memory_space<smem>>
    %41 = vector.broadcast %40 : i32 to vector<128x1xi32>
    %42 = arith.cmpi slt, %20, %41 : vector<128x1xi32>
    %43 = arith.andi %39, %42 : vector<128x1xi1>
    %cst_21 = arith.constant 0.000000e+00 : f32
    %44 = vector.shape_cast %43 : vector<128x1xi1> to vector<128x1xi1>
    %45 = vector.broadcast %44 : vector<128x1xi1> to vector<128x128xi1>
    %46 = vector.broadcast %cst_21 : f32 to vector<128x128xf32>
    %47 = arith.select %45, %14, %46 : vector<128x128xi1>, vector<128x128xf32>
    %cst_22 = arith.constant dense<0xFF800000> : vector<128xf32>
    %48 = vector.multi_reduction <maximumf>, %47, %cst_22 [0] : vector<128x128xf32> to vector<128xf32>
    %49 = vector.shape_cast %48 : vector<128xf32> to vector<1x128xf32>
    %c0_23 = arith.constant 0 : index
    %c1_24 = arith.constant 1 : index
    %c0_25 = arith.constant 0 : index
    %50 = vector.load %arg8[%c0_23, %c1_24, %c0_25] : memref<1x8x128xf32, #tpu.memory_space<vmem>>, vector<1x1x128xf32>
    %51 = vector.shape_cast %50 : vector<1x1x128xf32> to vector<1x128xf32>
    %52 = vector.shape_cast %49 : vector<1x128xf32> to vector<1x1x128xf32>
    tpu.vector_store %arg8[%c0_23, %c1_24, %c0_25], %52 {strides = array<i32>} : memref<1x8x128xf32, #tpu.memory_space<vmem>>, vector<1x1x128xf32>,
    %c2_26 = arith.constant 2 : index
    %53 = memref.load %arg1[%c2_26] : memref<9xi32, #tpu.memory_space<smem>>
    %54 = vector.broadcast %53 : i32 to vector<128x1xi32>
    %55 = arith.cmpi sge, %20, %54 : vector<128x1xi32>
    %c3 = arith.constant 3 : index
    %56 = memref.load %arg1[%c3] : memref<9xi32, #tpu.memory_space<smem>>
    %57 = vector.broadcast %56 : i32 to vector<128x1xi32>
    %58 = arith.cmpi slt, %20, %57 : vector<128x1xi32>
    %59 = arith.andi %55, %58 : vector<128x1xi1>
    %cst_27 = arith.constant 0.000000e+00 : f32
    %60 = vector.shape_cast %59 : vector<128x1xi1> to vector<128x1xi1>
    %61 = vector.broadcast %60 : vector<128x1xi1> to vector<128x128xi1>
    %62 = vector.broadcast %cst_27 : f32 to vector<128x128xf32>
    %63 = arith.select %61, %14, %62 : vector<128x128xi1>, vector<128x128xf32>
    %cst_28 = arith.constant dense<0xFF800000> : vector<128xf32>
    %64 = vector.multi_reduction <maximumf>, %63, %cst_28 [0] : vector<128x128xf32> to vector<128xf32>
    %65 = vector.shape_cast %64 : vector<128xf32> to vector<1x128xf32>
    %c0_29 = arith.constant 0 : index
    %c2_30 = arith.constant 2 : index
    %c0_31 = arith.constant 0 : index
    %66 = vector.load %arg8[%c0_29, %c2_30, %c0_31] : memref<1x8x128xf32, #tpu.memory_space<vmem>>, vector<1x1x128xf32>
    %67 = vector.shape_cast %66 : vector<1x1x128xf32> to vector<1x128xf32>
    %68 = vector.shape_cast %65 : vector<1x128xf32> to vector<1x1x128xf32>
    tpu.vector_store %arg8[%c0_29, %c2_30, %c0_31], %68 {strides = array<i32>} : memref<1x8x128xf32, #tpu.memory_space<vmem>>, vector<1x1x128xf32>,
    %c3_32 = arith.constant 3 : index
    %69 = memref.load %arg1[%c3_32] : memref<9xi32, #tpu.memory_space<smem>>
    %70 = vector.broadcast %69 : i32 to vector<128x1xi32>
    %71 = arith.cmpi sge, %20, %70 : vector<128x1xi32>
    %c4 = arith.constant 4 : index
    %72 = memref.load %arg1[%c4] : memref<9xi32, #tpu.memory_space<smem>>
    %73 = vector.broadcast %72 : i32 to vector<128x1xi32>
    %74 = arith.cmpi slt, %20, %73 : vector<128x1xi32>
    %75 = arith.andi %71, %74 : vector<128x1xi1>
    %cst_33 = arith.constant 0.000000e+00 : f32
    %76 = vector.shape_cast %75 : vector<128x1xi1> to vector<128x1xi1>
    %77 = vector.broadcast %76 : vector<128x1xi1> to vector<128x128xi1>
    %78 = vector.broadcast %cst_33 : f32 to vector<128x128xf32>
    %79 = arith.select %77, %14, %78 : vector<128x128xi1>, vector<128x128xf32>
    %cst_34 = arith.constant dense<0xFF800000> : vector<128xf32>
    %80 = vector.multi_reduction <maximumf>, %79, %cst_34 [0] : vector<128x128xf32> to vector<128xf32>
    %81 = vector.shape_cast %80 : vector<128xf32> to vector<1x128xf32>
    %c0_35 = arith.constant 0 : index
    %c3_36 = arith.constant 3 : index
    %c0_37 = arith.constant 0 : index
    %82 = vector.load %arg8[%c0_35, %c3_36, %c0_37] : memref<1x8x128xf32, #tpu.memory_space<vmem>>, vector<1x1x128xf32>
    %83 = vector.shape_cast %82 : vector<1x1x128xf32> to vector<1x128xf32>
    %84 = vector.shape_cast %81 : vector<1x128xf32> to vector<1x1x128xf32>
    tpu.vector_store %arg8[%c0_35, %c3_36, %c0_37], %84 {strides = array<i32>} : memref<1x8x128xf32, #tpu.memory_space<vmem>>, vector<1x1x128xf32>,
    %c4_38 = arith.constant 4 : index
    %85 = memref.load %arg1[%c4_38] : memref<9xi32, #tpu.memory_space<smem>>
    %86 = vector.broadcast %85 : i32 to vector<128x1xi32>
    %87 = arith.cmpi sge, %20, %86 : vector<128x1xi32>
    %c5 = arith.constant 5 : index
    %88 = memref.load %arg1[%c5] : memref<9xi32, #tpu.memory_space<smem>>
    %89 = vector.broadcast %88 : i32 to vector<128x1xi32>
    %90 = arith.cmpi slt, %20, %89 : vector<128x1xi32>
    %91 = arith.andi %87, %90 : vector<128x1xi1>
    %cst_39 = arith.constant 0.000000e+00 : f32
    %92 = vector.shape_cast %91 : vector<128x1xi1> to vector<128x1xi1>
    %93 = vector.broadcast %92 : vector<128x1xi1> to vector<128x128xi1>
    %94 = vector.broadcast %cst_39 : f32 to vector<128x128xf32>
    %95 = arith.select %93, %14, %94 : vector<128x128xi1>, vector<128x128xf32>
    %cst_40 = arith.constant dense<0xFF800000> : vector<128xf32>
    %96 = vector.multi_reduction <maximumf>, %95, %cst_40 [0] : vector<128x128xf32> to vector<128xf32>
    %97 = vector.shape_cast %96 : vector<128xf32> to vector<1x128xf32>
    %c0_41 = arith.constant 0 : index
    %c4_42 = arith.constant 4 : index
    %c0_43 = arith.constant 0 : index
    %98 = vector.load %arg8[%c0_41, %c4_42, %c0_43] : memref<1x8x128xf32, #tpu.memory_space<vmem>>, vector<1x1x128xf32>
    %99 = vector.shape_cast %98 : vector<1x1x128xf32> to vector<1x128xf32>
    %100 = vector.shape_cast %97 : vector<1x128xf32> to vector<1x1x128xf32>
    tpu.vector_store %arg8[%c0_41, %c4_42, %c0_43], %100 {strides = array<i32>} : memref<1x8x128xf32, #tpu.memory_space<vmem>>, vector<1x1x128xf32>,
    %c5_44 = arith.constant 5 : index
    %101 = memref.load %arg1[%c5_44] : memref<9xi32, #tpu.memory_space<smem>>
    %102 = vector.broadcast %101 : i32 to vector<128x1xi32>
    %103 = arith.cmpi sge, %20, %102 : vector<128x1xi32>
    %c6 = arith.constant 6 : index
    %104 = memref.load %arg1[%c6] : memref<9xi32, #tpu.memory_space<smem>>
    %105 = vector.broadcast %104 : i32 to vector<128x1xi32>
    %106 = arith.cmpi slt, %20, %105 : vector<128x1xi32>
    %107 = arith.andi %103, %106 : vector<128x1xi1>
    %cst_45 = arith.constant 0.000000e+00 : f32
    %108 = vector.shape_cast %107 : vector<128x1xi1> to vector<128x1xi1>
    %109 = vector.broadcast %108 : vector<128x1xi1> to vector<128x128xi1>
    %110 = vector.broadcast %cst_45 : f32 to vector<128x128xf32>
    %111 = arith.select %109, %14, %110 : vector<128x128xi1>, vector<128x128xf32>
    %cst_46 = arith.constant dense<0xFF800000> : vector<128xf32>
    %112 = vector.multi_reduction <maximumf>, %111, %cst_46 [0] : vector<128x128xf32> to vector<128xf32>
    %113 = vector.shape_cast %112 : vector<128xf32> to vector<1x128xf32>
    %c0_47 = arith.constant 0 : index
    %c5_48 = arith.constant 5 : index
    %c0_49 = arith.constant 0 : index
    %114 = vector.load %arg8[%c0_47, %c5_48, %c0_49] : memref<1x8x128xf32, #tpu.memory_space<vmem>>, vector<1x1x128xf32>
    %115 = vector.shape_cast %114 : vector<1x1x128xf32> to vector<1x128xf32>
    %116 = vector.shape_cast %113 : vector<1x128xf32> to vector<1x1x128xf32>
    tpu.vector_store %arg8[%c0_47, %c5_48, %c0_49], %116 {strides = array<i32>} : memref<1x8x128xf32, #tpu.memory_space<vmem>>, vector<1x1x128xf32>,
    %c6_50 = arith.constant 6 : index
    %117 = memref.load %arg1[%c6_50] : memref<9xi32, #tpu.memory_space<smem>>
    %118 = vector.broadcast %117 : i32 to vector<128x1xi32>
    %119 = arith.cmpi sge, %20, %118 : vector<128x1xi32>
    %c7 = arith.constant 7 : index
    %120 = memref.load %arg1[%c7] : memref<9xi32, #tpu.memory_space<smem>>
    %121 = vector.broadcast %120 : i32 to vector<128x1xi32>
    %122 = arith.cmpi slt, %20, %121 : vector<128x1xi32>
    %123 = arith.andi %119, %122 : vector<128x1xi1>
    %cst_51 = arith.constant 0.000000e+00 : f32
    %124 = vector.shape_cast %123 : vector<128x1xi1> to vector<128x1xi1>
    %125 = vector.broadcast %124 : vector<128x1xi1> to vector<128x128xi1>
    %126 = vector.broadcast %cst_51 : f32 to vector<128x128xf32>
    %127 = arith.select %125, %14, %126 : vector<128x128xi1>, vector<128x128xf32>
    %cst_52 = arith.constant dense<0xFF800000> : vector<128xf32>
    %128 = vector.multi_reduction <maximumf>, %127, %cst_52 [0] : vector<128x128xf32> to vector<128xf32>
    %129 = vector.shape_cast %128 : vector<128xf32> to vector<1x128xf32>
    %c0_53 = arith.constant 0 : index
    %c6_54 = arith.constant 6 : index
    %c0_55 = arith.constant 0 : index
    %130 = vector.load %arg8[%c0_53, %c6_54, %c0_55] : memref<1x8x128xf32, #tpu.memory_space<vmem>>, vector<1x1x128xf32>
    %131 = vector.shape_cast %130 : vector<1x1x128xf32> to vector<1x128xf32>
    %132 = vector.shape_cast %129 : vector<1x128xf32> to vector<1x1x128xf32>
    tpu.vector_store %arg8[%c0_53, %c6_54, %c0_55], %132 {strides = array<i32>} : memref<1x8x128xf32, #tpu.memory_space<vmem>>, vector<1x1x128xf32>,
    %c7_56 = arith.constant 7 : index
    %133 = memref.load %arg1[%c7_56] : memref<9xi32, #tpu.memory_space<smem>>
    %134 = vector.broadcast %133 : i32 to vector<128x1xi32>
    %135 = arith.cmpi sge, %20, %134 : vector<128x1xi32>
    %c8 = arith.constant 8 : index
    %136 = memref.load %arg1[%c8] : memref<9xi32, #tpu.memory_space<smem>>
    %137 = vector.broadcast %136 : i32 to vector<128x1xi32>
    %138 = arith.cmpi slt, %20, %137 : vector<128x1xi32>
    %139 = arith.andi %135, %138 : vector<128x1xi1>
    %cst_57 = arith.constant 0.000000e+00 : f32
    %140 = vector.shape_cast %139 : vector<128x1xi1> to vector<128x1xi1>
    %141 = vector.broadcast %140 : vector<128x1xi1> to vector<128x128xi1>
    %142 = vector.broadcast %cst_57 : f32 to vector<128x128xf32>
    %143 = arith.select %141, %14, %142 : vector<128x128xi1>, vector<128x128xf32>
    %cst_58 = arith.constant dense<0xFF800000> : vector<128xf32>
    %144 = vector.multi_reduction <maximumf>, %143, %cst_58 [0] : vector<128x128xf32> to vector<128xf32>
    %145 = vector.shape_cast %144 : vector<128xf32> to vector<1x128xf32>
    %c0_59 = arith.constant 0 : index
    %c7_60 = arith.constant 7 : index
    %c0_61 = arith.constant 0 : index
    %146 = vector.load %arg8[%c0_59, %c7_60, %c0_61] : memref<1x8x128xf32, #tpu.memory_space<vmem>>, vector<1x1x128xf32>
    %147 = vector.shape_cast %146 : vector<1x1x128xf32> to vector<1x128xf32>
    %148 = vector.shape_cast %145 : vector<1x128xf32> to vector<1x1x128xf32>
    tpu.vector_store %arg8[%c0_59, %c7_60, %c0_61], %148 {strides = array<i32>} : memref<1x8x128xf32, #tpu.memory_space<vmem>>, vector<1x1x128xf32>,
    return
  }
  func.func @transform_0(%arg0: i32, %arg1: memref<9xi32, #tpu.memory_space<smem>>) -> (i32, i32) {
    %c0_i32 = arith.constant 0 : i32
    %c0_i32_0 = arith.constant 0 : i32
    return %arg0, %c0_i32 : i32, i32
  }
  func.func @transform_1(%arg0: i32, %arg1: memref<9xi32, #tpu.memory_space<smem>>) -> (i32, i32) {
    %c0_i32 = arith.constant 0 : i32
    %c0_i32_0 = arith.constant 0 : i32
    %c0_i32_1 = arith.constant 0 : i32
    return %c0_i32, %c0_i32_0 : i32, i32
  }
  func.func @transform_2(%arg0: i32, %arg1: memref<9xi32, #tpu.memory_space<smem>>) -> (i32, i32) {
    %c0_i32 = arith.constant 0 : i32
    %c0_i32_0 = arith.constant 0 : i32
    %c0_i32_1 = arith.constant 0 : i32
    return %c0_i32, %c0_i32_0 : i32, i32
  }
  func.func @transform_3(%arg0: i32, %arg1: memref<9xi32, #tpu.memory_space<smem>>) -> (i32, i32) {
    %c0_i32 = arith.constant 0 : i32
    %c0_i32_0 = arith.constant 0 : i32
    %c0_i32_1 = arith.constant 0 : i32
    return %c0_i32, %c0_i32_0 : i32, i32
  }
  func.func @transform_4(%arg0: i32, %arg1: memref<9xi32, #tpu.memory_space<smem>>) -> (i32, i32) {
    %c0_i32 = arith.constant 0 : i32
    %c0_i32_0 = arith.constant 0 : i32
    %c0_i32_1 = arith.constant 0 : i32
    return %c0_i32, %c0_i32_0 : i32, i32
  }
  func.func @transform_5(%arg0: i32, %arg1: memref<9xi32, #tpu.memory_space<smem>>) -> (i32, i32) {
    %c0_i32 = arith.constant 0 : i32
    %c0_i32_0 = arith.constant 0 : i32
    return %arg0, %c0_i32 : i32, i32
  }
  func.func @transform_6(%arg0: i32, %arg1: memref<9xi32, #tpu.memory_space<smem>>) -> (i32, i32, i32) {
    %c0_i32 = arith.constant 0 : i32
    %c0_i32_0 = arith.constant 0 : i32
    %c0_i32_1 = arith.constant 0 : i32
    return %arg0, %c0_i32, %c0_i32_0 : i32, i32, i32
  }
}

</mosaic_0001>

<bundles_post_ra>
// kernel: tpu_custom_call.1
= control target key start
LH: loop header
LB: loop body
LE: loop exit
PB: predicated region body
PF: predicated region fallthrough
CT: control target
= control target key end

     0   :  { %s5243_s0 = inlined_call_operand.vmem [shape: s32[9], index: 0, kind: input, shape index: {}]   ;;  %s5244_s1 = inlined_call_operand.vmem [shape: f32[512,16], index: 1, kind: input, shape index: {}]   ;;  %s5245_s2 = inlined_call_operand.vmem [shape: f32[16,128], index: 2, kind: input, shape index: {}]   ;;  %s5246_s3 = inlined_call_operand.vmem [shape: f32[1,128], index: 3, kind: input, shape index: {}]   ;;  %s5247_s4 = inlined_call_operand.vmem [shape: f32[128,128], index: 4, kind: input, shape index: {}]   ;;  %s5248_s5 = inlined_call_operand.vmem [shape: f32[1,128], index: 5, kind: input, shape index: {}]   ;;  %s5249_s6 = inlined_call_operand.hbm [shape: bf16[512,128], index: 6, kind: output, shape index: {0}]   ;;  %s5250_s7 = inlined_call_operand.hbm [shape: f32[4,8,128], index: 7, kind: output, shape index: {1}]  }
   0x1   :  { %s13_s26 = sshll.u32 %s5243_s0, 4  ;;  %s14_s26 = int_to_ptr.vmem [resolvable:$true] %s13_s26 }
   0x2   :  { %s2269_s27 = scalar_lea.vmem %s14_s26, 16  ;;  %p2274_p1 = scmp.lt.s32.totalorder %s14_s26, %s14_s26 }
   0x3   :  { %p2270_p0 = scmp.ne.s32.totalorder %s14_s26, %s2269_s27  ;;  %p2275_p2 = scmp.lt.s32.totalorder %s2269_s27, %s2269_s27 }
   0x5   :  { %p2276_p3 = por %p2275_p2, %p2274_p1 }
   0x7   :  { %p2277_p4 = pnand %p2276_p3, %p2270_p0 }
   0x9   :  { %2280 = shalt.err (!%p2277_p4)  }
   0xa   :  { %s2379_s28 = smov [#allocation3]  }
   0xb   :  { %16 = dma.vmem_to_smem %s14_s26, 16, %s2379_s28, [#allocation2] }
   0xc   :  { %2353 = dma.done.wait [#allocation2], 16 }
   0xd   :  { %2354 = vsyncadd [#allocation2], 4294967280 }
   0xe   :  { %18 = sfence }
   0xf   :  { %19 = vsyncpa [#allocation5], 0 }
  0x10   :  { %21 = vsyncpa [#allocation5 + $0x1], 0 }
  0x11   :  { %22 = vsyncpa [#allocation7], 0 }
  0x12   :  { %24 = vsyncpa [#allocation7 + $0x1], 0  ;;  %s2427_s29 = smov 0   ;;  %s2429_s0 = smov 0  }
  0x13   :  { %s2431_s30 = smov 0   ;;  %s2433_s8 = smov 0  }
  0x14 LB: > { %s2448_s9 = sadd.s32 4294967295, %s2377_s8   ;;  %s1907_s10 = sadd.s32 4294967294, %s2377_s8   ;;  %s2377_s8 = sphi %s2433_s8, %s6029_s8   ;;  %s2373_s30 = sphi %s2431_s30, %s6028_s30   ;;  %s2369_s0 = sphi %s2429_s0, %s6027_s0   ;;  %s2365_s29 = sphi %s2427_s29, %s6026_s29  }
  0x15   : > { %s2452_s11 = sadd.s32 1, %s2377_s8   ;;  %s147_s12 = sadd.s32 1, %s2373_s30 }
  0x16   : > { %s144_s13 = ssub.s32 %s2377_s8, %s2452_s11  ;;  %p157_p5 = scmp.ne.s32.totalorder %s2373_s30, %s2369_s0 }
  0x17   : > { %p145_p6 = scmp.eq.s32.totalorder %s144_s13, 0  ;;  %p158_p7 = scmp.eq.s32.totalorder %s2448_s9, 3 }
  0x18   : > { %p163_p8 = scmp.ne.s32.totalorder %s2369_s0, %s2365_s29  ;;  %p164_p9 = scmp.eq.s32.totalorder %s1907_s10, 3 }
  0x19   : > { %s2463_s14 = scalar_select %p145_p6, %s2373_s30, %s147_s12  }
  0x1a   : > { %p2465_p10 = por %p158_p7, %p157_p5  ;;  %p2469_p11 = por %p164_p9, %p163_p8 }
  0x1b   : > { %p1910_p12 = scmp.ge.s32.totalorder %s2377_s8, 1  ;;  %p229_p13 = scmp.lt.s32.totalorder %s2377_s8, 5 }
  0x1d   : > { %p230_p0 = pnand %p1910_p12, %p229_p13 }
  0x1f   : > { %233 = sbr.rel (%p230_p0) target bundleno = 695 (0x2b7), region = 40 }
  0x26   : > { %v287_v0 = vld [vmem:[%s5245_s2] sm:$0xff]  ;;  %v288_v1 = vld [vmem:[%s5245_s2 + $0x8] sm:$0xff]  ;;  %s1913_s21 = sshll.u32 %s2448_s9, 4  ;;  %v508_v5 = vld [vmem:[%s5247_s4 + $0x10] sm:$0xff]  ;;  %vm296_vm0 = vcmask 130048   ;;  %s1949_s13 = sshll.u32 %s2448_s9, 7 }
  0x27   : > { %v506_v2 = vld [vmem:[%s5247_s4] sm:$0xff]  ;;  %v2170_v3 = vpack.c.bf16 %v288_v1, %v287_v0  ;;  %p265_p1 = scmp.lt.s32.totalorder %s1913_s21, 63  ;;  %v507_v4 = vld [vmem:[%s5247_s4 + $0x8] sm:$0xff]  ;;  %v509_v6 = vld [vmem:[%s5247_s4 + $0x18] sm:$0xff]  ;;  %s1950_s17 = sld [smem:[#allocation3 + $0x1]] }
  0x28   : > { %v2174_v7 = vpack.c.bf16 %v507_v4, %v506_v2  ;;  %v2178_v8 = vpack.c.bf16 %v509_v6, %v508_v5  ;;  %v510_v9 = vld [vmem:[%s5247_s4 + $0x20] sm:$0xff]  ;;  %v511_v10 = vld [vmem:[%s5247_s4 + $0x28] sm:$0xff]  ;;  %v512_v16 = vld [vmem:[%s5247_s4 + $0x30] sm:$0xff]  ;;  %s1952_s19 = sld [smem:[#allocation3 + $0x2]]  ;;  %s1954_s20 = sld [smem:[#allocation3 + $0x3]] }
  0x29   : > { %2171 = vmatprep.subr.bf16.mxu0 %v2170_v3  ;;  %s6031_s21 = smov (!%p265_p1, %s1913_s21), 63  ;;  %v2182_v14 = vpack.c.bf16 %v511_v10, %v510_v9  ;;  %v513_v17 = vld [vmem:[%s5247_s4 + $0x38] sm:$0xff]  ;;  %v514_v21 = vld [vmem:[%s5247_s4 + $0x40] sm:$0xff]  ;;  %v515_v22 = vld [vmem:[%s5247_s4 + $0x48] sm:$0xff]  ;;  %s2635_s22 = sld [smem:[#allocation3 + $0x4]] }
  0x2a   : > { %2173 = vmatpush3.bf16.msra.mxu0 %v2170_v3  ;;  %2206 = vmatprep.subr.bf16.mxu1 %v2174_v7  ;;  %s1914_s12 = sshll.u32 %s6031_s21, 3  ;;  %v2186_v19 = vpack.c.bf16 %v513_v17, %v512_v16  ;;  %v2190_v24 = vpack.c.bf16 %v515_v22, %v514_v21  ;;  %v516_v26 = vld [vmem:[%s5247_s4 + $0x50] sm:$0xff]  ;;  %v517_v27 = vld [vmem:[%s5247_s4 + $0x58] sm:$0xff]  ;;  %v518_v31 = vld [vmem:[%s5247_s4 + $0x60] sm:$0xff]  ;;  %s2655_s23 = sld [smem:[#allocation3 + $0x5]] }
  0x2b   : > { %2175 = vmatprep.subr.bf16.mxu0 %v2174_v7  ;;  %2214 = vmatpush3.bf16.msra.mxu1 %v2174_v7  ;;  %s2497_s18 = scalar_lea.vmem %s5244_s1, %s1914_s12  ;;  %v2194_v29 = vpack.c.bf16 %v517_v27, %v516_v26  ;;  %v519_v32 = vld [vmem:[%s5247_s4 + $0x68] sm:$0xff]  ;;  %v520_v40 = vld [vmem:[%s5247_s4 + $0x70] sm:$0xff]  ;;  %v521_v41 = vld [vmem:[%s5247_s4 + $0x78] sm:$0xff]  ;;  %s2675_s21 = sld [smem:[#allocation3 + $0x6]] }
  0x2c   : > { %2207 = vmatprep.subr.bf16.mxu1 %v2178_v8  ;;  %v271_v11 = vld [vmem:[%s2497_s18] sm:$0xff]  ;;  %v272_v12 = vld [vmem:[%s2497_s18 + $0x8] sm:$0xff]  ;;  %v273_v13 = vld [vmem:[%s2497_s18 + $0x10] sm:$0xff]  ;;  %v2198_v34 = vpack.c.bf16 %v519_v32, %v518_v31  ;;  %v2202_v42 = vpack.c.bf16 %v521_v41, %v520_v40  ;;  %v2576_v31 = vstv %s1949_s13  ;;  %s2756_s24 = sld [smem:[#allocation3 + $0x7]]  ;;  %s2758_s25 = sld [smem:[#allocation3 + $0x8]] }
  0x2d   : > { %2090 = vmatprep.mubr.msk.f32.mxu0 %vm296_vm0, %v271_v11  ;;  %v274_v15 = vld [vmem:[%s2497_s18 + $0x18] sm:$0xff]  ;;  %v275_v18 = vld [vmem:[%s2497_s18 + $0x20] sm:$0xff]  ;;  %v276_v20 = vld [vmem:[%s2497_s18 + $0x28] sm:$0xff]  ;;  %s2798_s28 = sand.u32 1, %s2369_s0  }
  0x2e   : > { %2091 = vmatmul.mubr.msk.f32.vlgmr.msra.gmra.mrb[0].mxu0 %vm296_vm0, %v272_v12  ;;  %v277_v23 = vld [vmem:[%s2497_s18 + $0x30] sm:$0xff]  ;;  %v278_v25 = vld [vmem:[%s2497_s18 + $0x38] sm:$0xff]  ;;  %v279_v28 = vld [vmem:[%s2497_s18 + $0x40] sm:$0xff]  ;;  %v2595_v40 = vstv %s1952_s19  ;;  %s1911_s10 = sshll.u32 %s2798_s28, 6 }
  0x2f   : > { %2215 = vmatpush3.bf16.msra.mxu1 %v2178_v8  ;;  %2093 = vmatprep.mubr.msk.f32.mxu0 %vm296_vm0, %v273_v13  ;;  %v280_v30 = vld [vmem:[%s2497_s18 + $0x48] sm:$0xff]  ;;  %v281_v33 = vld [vmem:[%s2497_s18 + $0x50] sm:$0xff]  ;;  %v282_v35 = vld [vmem:[%s2497_s18 + $0x58] sm:$0xff]  ;;  %s3125_s12 = scalar_lea.vmem [#allocation4], %s1911_s10 }
  0x30   : > { %2177 = vmatpush3.bf16.msra.mxu0 %v2174_v7  ;;  %2208 = vmatprep.subr.bf16.mxu1 %v2182_v14  ;;  %v283_v36 = vld [vmem:[%s2497_s18 + $0x60] sm:$0xff]  ;;  %v284_v37 = vld [vmem:[%s2497_s18 + $0x68] sm:$0xff]  ;;  %v285_v38 = vld [vmem:[%s2497_s18 + $0x70] sm:$0xff] }
  0x31   : > { %2179 = vmatprep.subr.bf16.mxu0 %v2178_v8  ;;  %v286_v39 = vld [vmem:[%s2497_s18 + $0x78] sm:$0xff]  ;;  %v1915_v43 = vld [vmem:[%s5246_s3] ss:$0 sm:$0xff]  ;;  %s805_s18 = sld [smem:[#allocation3]] }
  0x32   : > { %2094 = vmatmul.mubr.msk.f32.gmra.mrb[2].mxu0 %vm296_vm0, %v274_v15 }
  0x33   : > { %2216 = vmatpush3.bf16.msra.mxu1 %v2182_v14  ;;  %2096 = vmatprep.mubr.msk.f32.mxu0 %vm296_vm0, %v275_v18 }
  0x34   : > { %2181 = vmatpush3.bf16.msra.mxu0 %v2178_v8  ;;  %2209 = vmatprep.subr.bf16.mxu1 %v2186_v19 }
  0x35   : > { %2183 = vmatprep.subr.bf16.mxu0 %v2182_v14 }
  0x36   : > { %2097 = vmatmul.mubr.msk.f32.gmra.mrb[4].mxu0 %vm296_vm0, %v276_v20 }
  0x37   : > { %2217 = vmatpush3.bf16.msra.mxu1 %v2186_v19  ;;  %2099 = vmatprep.mubr.msk.f32.mxu0 %vm296_vm0, %v277_v23 }
  0x38   : > { %2185 = vmatpush3.bf16.msra.mxu0 %v2182_v14  ;;  %2210 = vmatprep.subr.bf16.mxu1 %v2190_v24 }
  0x39   : > { %2187 = vmatprep.subr.bf16.mxu0 %v2186_v19 }
  0x3a   : > { %2100 = vmatmul.mubr.msk.f32.gmra.mrb[6].mxu0 %vm296_vm0, %v278_v25 }
  0x3b   : > { %2218 = vmatpush3.bf16.msra.mxu1 %v2190_v24  ;;  %2102 = vmatprep.mubr.msk.f32.mxu0 %vm296_vm0, %v279_v28  ;;  %v771_v28 = vlaneseq }
  0x3c   : > { %2189 = vmatpush3.bf16.msra.mxu0 %v2186_v19  ;;  %2211 = vmatprep.subr.bf16.mxu1 %v2194_v29 }
  0x3d   : > { %2191 = vmatprep.subr.bf16.mxu0 %v2190_v24 }
  0x3e   : > { %2103 = vmatmul.mubr.msk.f32.gmra.mrb[8].mxu0 %vm296_vm0, %v280_v30 }
  0x3f   : > { %2219 = vmatpush3.bf16.msra.mxu1 %v2194_v29  ;;  %2105 = vmatprep.mubr.msk.f32.mxu0 %vm296_vm0, %v281_v33 }
  0x40   : > { %2193 = vmatpush3.bf16.msra.mxu0 %v2190_v24  ;;  %2212 = vmatprep.subr.bf16.mxu1 %v2198_v34 }
  0x41   : > { %2195 = vmatprep.subr.bf16.mxu0 %v2194_v29 }
  0x42   : > { %2106 = vmatmul.mubr.msk.f32.gmra.mrb[10].mxu0 %vm296_vm0, %v282_v35 }
  0x43   : > { %2220 = vmatpush3.bf16.msra.mxu1 %v2198_v34  ;;  %2108 = vmatprep.mubr.msk.f32.mxu0 %vm296_vm0, %v283_v36  ;;  %v2587_v36 = vstv %s805_s18  ;;  %s1988_s18 = sshll.u32 %s2448_s9, 10 }
  0x44   : > { %2197 = vmatpush3.bf16.msra.mxu0 %v2194_v29  ;;  %2213 = vmatprep.subr.bf16.mxu1 %v2202_v42  ;;  %v2570_v29 = vshrl.u32 %v771_v28, 7 }
  0x45   : > { %2199 = vmatprep.subr.bf16.mxu0 %v2198_v34 }
  0x46   : > { %2109 = vmatmul.mubr.msk.f32.gmra.mrb[12].mxu0 %vm296_vm0, %v284_v37  ;;  %v773_v30 = vadd.s32 8, %v2570_v29  ;;  %v775_v32 = vadd.s32 24, %v2570_v29  ;;  %v2585_v35 = vadd.s32 %v2576_v31, %v2570_v29  ;;  %v2589_v37 = vstv %s1950_s17  ;;  %s1800_s17 = sshll.u32 %s3125_s12, 4  ;;  %s3988_s17 = int_to_ptr.vmem [resolvable:$true] %s1800_s17 }
  0x47   : > { %2111 = vmatprep.mubr.msk.f32.mxu0 %vm296_vm0, %v285_v38  ;;  %2221 = vmatpush3.bf16.msra.mxu1 %v2202_v42  ;;  %v777_v38 = vadd.s32 40, %v2570_v29  ;;  %v776_v41 = vadd.s32 32, %v2570_v29 }
  0x48   : > { %2201 = vmatpush3.bf16.msra.mxu0 %v2198_v34  ;;  %v2580_v33 = vadd.s32 %v2576_v31, %v773_v30  ;;  %v774_v34 = vadd.s32 16, %v2570_v29  ;;  %5336 = vst [vmem:[#allocation12_spill] sm:$0xff] %v2585_v35  ;;  %vm807_vm2 = vcmp.ge.s32.totalorder %v2585_v35, %v2587_v36  ;;  %vm825_vm3 = vcmp.lt.s32.totalorder %v2585_v35, %v2589_v37 }
  0x49   : > { %2203 = vmatprep.subr.bf16.mxu0 %v2202_v42  ;;  %vm929_vm5 = vcmp.ge.s32.totalorder %v2585_v35, %v2589_v37  ;;  %vm947_vm7 = vcmp.lt.s32.totalorder %v2585_v35, %v2595_v40 }
  0x4a   : > { %2112 = vmatmul.mubr.msk.f32.gmra.mrb[14].mxu0 %vm296_vm0, %v286_v39  ;;  %5335 = vst [vmem:[#allocation11_spill] sm:$0xff] %v2580_v33  ;;  %v2593_v39 = vadd.s32 %v2576_v31, %v775_v32  ;;  %vm808_vm1 = vcmp.ge.s32.totalorder %v2580_v33, %v2587_v36  ;;  %vm826_vm4 = vcmp.lt.s32.totalorder %v2580_v33, %v2589_v37  ;;  %vm2721_vm0 = vmand %vm807_vm2, %vm825_vm3 }
  0x4b   : > { %vm930_vm6 = vcmp.ge.s32.totalorder %v2580_v33, %v2589_v37  ;;  %vm948_vm8 = vcmp.lt.s32.totalorder %v2580_v33, %v2595_v40  ;;  %vm2705_vm12 = vmand %vm808_vm1, %vm826_vm4  ;;  %vm5352_vm3 = vcmp.ge.s32.totalorder %v2585_v35, %v2595_v40 }
  0x4c   : > { %2205 = vmatpush3.bf16.msra.mxu0 %v2202_v42  ;;  %v2601_v42 = vadd.s32 %v2576_v31, %v774_v34  ;;  %vm828_vm11 = vcmp.lt.s32.totalorder %v2593_v39, %v2589_v37  ;;  %vm2731_vm1 = vmand %vm929_vm5, %vm947_vm7 }
  0x4d   : > { %vm2750_vm5 = vmand %vm930_vm6, %vm948_vm8  ;;  %vm5349_vm6 = vcmp.ge.s32.totalorder %v2593_v39, %v2587_v36 }
  0x4e   : > { %vm2780_vm8 = vmand %vm5349_vm6, %vm828_vm11  ;;  %vm5360_vm6 = vcmp.ge.s32.totalorder %v2580_v33, %v2595_v40  ;;  %vm5368_vm11 = vcmp.lt.s32.totalorder %v2601_v42, %v2595_v40  ;;  %vm5369_vm7 = vcmp.ge.s32.totalorder %v2601_v42, %v2589_v37 }
  0x4f   : > { %vm2865_vm13 = vmand %vm5369_vm7, %vm5368_vm11 }
 0x101   : > { %v2092_v44 = vpop.f32.mrb[0].mxu0 }
 0x102   : > { %v417_v45 = vadd.f32 %v2092_v44, %v1915_v43  ;;  %v411_v46 = vpop.f32.mrb[1].mxu0  ;;  %v779_v44 = vadd.s32 56, %v2570_v29 }
 0x103   : > { %v412_v47 = vadd.f32 %v1915_v43, %v411_v46  ;;  %v778_v46 = vadd.s32 48, %v2570_v29 }
 0x104   : > { %v491_v50 = vmax.f32 %v417_v45, 0.0  ;;  %v2621_v45 = vadd.s32 %v2576_v31, %v777_v38  ;;  %v5457_v38 = vmov 0 }
 0x105   : > { %v490_v48 = vmax.f32 %v412_v47, 0.0  ;;  %v2095_v49 = vpop.f32.mrb[2].mxu0  ;;  %v2629_v47 = vadd.s32 %v2576_v31, %v776_v41  ;;  %v5415_v41 = vmov 0 }
 0x106   : > { %v427_v51 = vadd.f32 %v2095_v49, %v1915_v43  ;;  %v421_v52 = vpop.f32.mrb[3].mxu0  ;;  %v2659_v49 = vadd.s32 %v2576_v31, %v779_v44  ;;  %vm5380_vm11 = vcmp.lt.s32.totalorder %v2621_v45, %v2589_v37  ;;  %v3044_v44 = vstv %s2756_s24  ;;  %s2380_s24 = smov [#allocation4]  }
 0x107   : > { %v422_v53 = vadd.f32 %v1915_v43, %v421_v52  ;;  %2146 = vmatprep.mubr.f32.mxu0 %v490_v48  ;;  %v781_v48 = vadd.s32 72, %v2570_v29  ;;  %v782_v52 = vadd.s32 80, %v2570_v29  ;;  %5418 = vst [vmem:[#allocation25_spill] sm:$0xff] %v3044_v44 }
 0x108   : > { %2147 = vmatmul.mubr.f32.vlgmr.msra.gmra.mrb[16].mxu0 %v491_v50  ;;  %v493_v56 = vmax.f32 %v427_v51, 0.0  ;;  %5337 = vst [vmem:[#allocation13_spill] sm:$0xff] %v2659_v49  ;;  %v780_v50 = vadd.s32 64, %v2570_v29  ;;  %v2669_v51 = vadd.s32 %v2576_v31, %v778_v46  ;;  %v3047_v46 = vstv %s2758_s25  ;;  %s2285_s25 = sshll.u32 %s2380_s24, 4  ;;  %s2286_s25 = int_to_ptr.vmem [resolvable:$false] %s2285_s25 }
 0x109   : > { %v492_v54 = vmax.f32 %v422_v53, 0.0  ;;  %v2098_v55 = vpop.f32.mrb[4].mxu0  ;;  %v783_v53 = vadd.s32 88, %v2570_v29  ;;  %5419 = vst [vmem:[#allocation26_spill] sm:$0xff] %v3047_v46  ;;  %s2287_s26 = scalar_lea.vmem %s2286_s25, 2048  ;;  %p2288_p5 = scmp.lt.s32.totalorder %s3988_s17, %s2286_s25 }
 0x10a   : > { %v437_v57 = vadd.f32 %v2098_v55, %v1915_v43  ;;  %v431_v58 = vpop.f32.mrb[5].mxu0  ;;  %5338 = vst [vmem:[#allocation14_spill] sm:$0xff] %v2669_v51  ;;  %v784_v55 = vadd.s32 96, %v2570_v29 }
 0x10b   : > { %v432_v59 = vadd.f32 %v1915_v43, %v431_v58  ;;  %2149 = vmatprep.mubr.f32.mxu0 %v492_v54  ;;  %v785_v54 = vadd.s32 104, %v2570_v29 }
 0x10c   : > { %2150 = vmatmul.mubr.f32.gmra.mrb[18].mxu0 %v493_v56  ;;  %v495_v62 = vmax.f32 %v437_v57, 0.0  ;;  %v787_v56 = vadd.s32 120, %v2570_v29  ;;  %v2693_v57 = vadd.s32 %v2576_v31, %v781_v48 }
 0x10d   : > { %v494_v60 = vmax.f32 %v432_v59, 0.0  ;;  %v2101_v61 = vpop.f32.mrb[6].mxu0  ;;  %v786_v59 = vadd.s32 112, %v2570_v29 }
 0x10e   : > { %v447_v63 = vadd.f32 %v2101_v61, %v1915_v43  ;;  %v441_v0 = vpop.f32.mrb[7].mxu0 }
 0x10f   : > { %2152 = vmatprep.mubr.f32.mxu0 %v494_v60  ;;  %v442_v1 = vadd.f32 %v1915_v43, %v441_v0  ;;  %v2711_v60 = vadd.s32 %v2576_v31, %v780_v50  ;;  %v5346_v0 = vmov 0 }
 0x110   : > { %2153 = vmatmul.mubr.f32.gmra.mrb[20].mxu0 %v495_v62  ;;  %v497_v4 = vmax.f32 %v447_v63, 0.0  ;;  %v2736_v63 = vstv %s2635_s22  ;;  %v5347_v0 = vsel %vm2750_vm5, 4294967295, %v5346_v0  ;;  %s3986_s22 = scalar_lea.hbm %s5249_s6, %s1988_s18 }
 0x111   : > { %v2104_v2 = vpop.f32.mrb[8].mxu0  ;;  %v496_v3 = vmax.f32 %v442_v1, 0.0  ;;  %5341 = vst [vmem:[#allocation15_spill] sm:$0xff] %v2711_v60  ;;  %v2763_v1 = vld [vmem:[%s5248_s5] ss:$0 sm:$0xff] }
 0x112   : > { %v457_v5 = vadd.f32 %v2104_v2, %v1915_v43  ;;  %v451_v6 = vpop.f32.mrb[9].mxu0  ;;  %v2766_v2 = vadd.s32 %v2576_v31, %v782_v52  ;;  %v5422_v52 = vmov 0 }
 0x113   : > { %v452_v7 = vadd.f32 %v1915_v43, %v451_v6  ;;  %2155 = vmatprep.mubr.f32.mxu1 %v496_v3  ;;  %v2769_v3 = vadd.s32 %v2576_v31, %v783_v53  ;;  %v5353_v6 = vmov 0 }
 0x114   : > { %2156 = vmatmul.mubr.f32.vlgmr.msra.gmra.mrb[0].mxu1 %v497_v4  ;;  %v499_v10 = vmax.f32 %v457_v5, 0.0  ;;  %v2772_v4 = vadd.s32 %v2576_v31, %v785_v54  ;;  %v5350_v5 = vmov 0 }
 0x115   : > { %v498_v8 = vmax.f32 %v452_v7, 0.0  ;;  %v2107_v9 = vpop.f32.mrb[10].mxu0  ;;  %v5351_v5 = vsel %vm2780_vm8, 4294967295, %v5350_v5  ;;  %v2795_v7 = vstv %s2655_s23  ;;  %s1782_s23 = scalar_lea.sflag [#allocation5], %s2798_s28 }
 0x116   : > { %v467_v11 = vadd.f32 %v2107_v9, %v1915_v43  ;;  %v461_v12 = vpop.f32.mrb[11].mxu0  ;;  %5348 = vst [vmem:[#allocation16_spill] sm:$0xff] %v2772_v4  ;;  %v2804_v9 = vadd.s32 %v2576_v31, %v787_v56 }
 0x117   : > { %v462_v13 = vadd.f32 %v1915_v43, %v461_v12  ;;  %2158 = vmatprep.mubr.f32.mxu1 %v498_v8  ;;  %v2801_v8 = vadd.s32 %v2576_v31, %v784_v55  ;;  %v5426_v55 = vmov 0 }
 0x118   : > { %2159 = vmatmul.mubr.f32.gmra.mrb[2].mxu1 %v499_v10  ;;  %v501_v16 = vmax.f32 %v467_v11, 0.0  ;;  %5355 = vst [vmem:[#allocation17_spill] sm:$0xff] %v2804_v9  ;;  %v5358_v10 = vmov 0  ;;  %v5361_v11 = vmov 0 }
 0x119   : > { %v500_v14 = vmax.f32 %v462_v13, 0.0  ;;  %v2110_v15 = vpop.f32.mrb[12].mxu0  ;;  %v2839_v13 = vadd.s32 %v2576_v31, %v786_v59  ;;  %v5410_v31 = vmov 0  ;;  %v5431_v59 = vmov 0 }
 0x11a   : > { %v477_v17 = vadd.f32 %v2110_v15, %v1915_v43  ;;  %v471_v18 = vpop.f32.mrb[13].mxu0  ;;  %v5370_v15 = vmov 0 }
 0x11b   : > { %v472_v19 = vadd.f32 %v1915_v43, %v471_v18  ;;  %2161 = vmatprep.mubr.f32.mxu1 %v500_v14  ;;  %5363 = vst [vmem:[#allocation18_spill] sm:$0xff] %v2839_v13  ;;  %v5366_v14 = vmov 0  ;;  %v5371_v15 = vsel %vm2865_vm13, 4294967295, %v5370_v15  ;;  %vm5404_vm13 = vcmp.lt.s32.totalorder %v2629_v47, %v2595_v40 }
 0x11c   : > { %2162 = vmatmul.mubr.f32.gmra.mrb[4].mxu1 %v501_v16  ;;  %v503_v22 = vmax.f32 %v477_v17, 0.0  ;;  %v5374_v16 = vmov 0  ;;  %v2884_v17 = vstv %s2675_s21  ;;  %s2281_s21 = scalar_lea.vmem %s3988_s17, 1024 }
 0x11d   : > { %v502_v20 = vmax.f32 %v472_v19, 0.0  ;;  %v2113_v21 = vpop.f32.mrb[14].mxu0  ;;  %p2282_p2 = scmp.ne.s32.totalorder %s3988_s17, %s2281_s21  ;;  %p2289_p6 = scmp.lt.s32.totalorder %s2287_s26, %s2281_s21 }
 0x11e   : > { %v487_v23 = vadd.f32 %v2113_v21, %v1915_v43  ;;  %v481_v24 = vpop.f32.mrb[15].mxu0 }
 0x11f   : > { %v482_v25 = vadd.f32 %v1915_v43, %v481_v24  ;;  %2164 = vmatprep.mubr.f32.mxu1 %v502_v20  ;;  %v2617_v43 = vstv %s1954_s20  ;;  %v5378_v20 = vmov 0  ;;  %v5390_v24 = vmov 0  ;;  %p2283_p3 = pnand %p2282_p2, %p2465_p10  ;;  %p2290_p7 = por %p2289_p6, %p2288_p5 }
 0x120   : > { %2165 = vmatmul.mubr.f32.gmra.mrb[6].mxu1 %v503_v22  ;;  %v505_v27 = vmax.f32 %v487_v23, 0.0  ;;  %vm1069_vm14 = vcmp.lt.s32.totalorder %v2585_v35, %v2617_v43  ;;  %vm1070_vm10 = vcmp.lt.s32.totalorder %v2580_v33, %v2617_v43  ;;  %v5382_v22 = vmov 0 }
 0x121   : > { %v504_v26 = vmax.f32 %v482_v25, 0.0  ;;  %vm2790_vm4 = vmand %vm5352_vm3, %vm1069_vm14  ;;  %vm5356_vm14 = vcmp.lt.s32.totalorder %v2593_v39, %v2595_v40  ;;  %vm5357_vm3 = vcmp.ge.s32.totalorder %v2593_v39, %v2589_v37  ;;  %v5386_v23 = vmov 0  ;;  %p2284_p4 = pneg %p2283_p3 }
 0x122   : > { %v5354_v6 = vsel %vm2790_vm4, 4294967295, %v5353_v6  ;;  %vm2816_vm15 = vmand %vm5357_vm3, %vm5356_vm14  ;;  %vm5440_vm4 = vcmp.ge.s32.totalorder %v2669_v51, %v2589_v37 }
 0x123   : > { %2167 = vmatprep.mubr.f32.mxu1 %v504_v26  ;;  %v5359_v10 = vsel %vm2816_vm15, 4294967295, %v5358_v10  ;;  %vm2830_vm9 = vmand %vm5360_vm6, %vm1070_vm10  ;;  %vm5364_vm10 = vcmp.lt.s32.totalorder %v2601_v42, %v2589_v37  ;;  %vm5365_vm6 = vcmp.ge.s32.totalorder %v2601_v42, %v2587_v36  ;;  %v5396_v26 = vmov 0  ;;  %p2291_p8 = pnand %p2290_p7, %p2284_p4 }
 0x124   : > { %2168 = vmatmul.mubr.f32.gmra.mrb[8].mxu1 %v505_v27  ;;  %v5362_v11 = vsel %vm2830_vm9, 4294967295, %v5361_v11  ;;  %vm2851_vm14 = vmand %vm5365_vm6, %vm5364_vm10  ;;  %vm5372_vm10 = vcmp.lt.s32.totalorder %v2601_v42, %v2617_v43  ;;  %vm5373_vm6 = vcmp.ge.s32.totalorder %v2601_v42, %v2595_v40  ;;  %v5400_v27 = vmov 0 }
 0x125   : > { %v5367_v14 = vsel %vm2851_vm14, 4294967295, %v5366_v14  ;;  %vm2875_vm3 = vmand %vm5373_vm6, %vm5372_vm10  ;;  %vm5376_vm10 = vcmp.lt.s32.totalorder %v2593_v39, %v2617_v43  ;;  %vm5377_vm6 = vcmp.ge.s32.totalorder %v2593_v39, %v2595_v40  ;;  %vm5384_vm14 = vcmp.lt.s32.totalorder %v2621_v45, %v2595_v40 }
 0x126   : > { %v5375_v16 = vsel %vm2875_vm3, 4294967295, %v5374_v16  ;;  %vm2897_vm2 = vmand %vm5377_vm6, %vm5376_vm10  ;;  %vm5381_vm10 = vcmp.ge.s32.totalorder %v2621_v45, %v2587_v36  ;;  %vm5385_vm3 = vcmp.ge.s32.totalorder %v2621_v45, %v2589_v37  ;;  %vm5430_vm9 = vcmp.ge.s32.totalorder %v2669_v51, %v2587_v36 }
 0x127   : > { %v5379_v20 = vsel %vm2897_vm2, 4294967295, %v5378_v20  ;;  %vm2915_vm6 = vmand %vm5381_vm10, %vm5380_vm11  ;;  %vm5388_vm10 = vcmp.lt.s32.totalorder %v2585_v35, %v2736_v63  ;;  %vm5398_vm2 = vcmp.lt.s32.totalorder %v2580_v33, %v2736_v63 }
 0x128   : > { %v5383_v22 = vsel %vm2915_vm6, 4294967295, %v5382_v22  ;;  %vm2925_vm7 = vmand %vm5385_vm3, %vm5384_vm14  ;;  %vm5389_vm6 = vcmp.ge.s32.totalorder %v2585_v35, %v2617_v43  ;;  %vm5414_vm3 = vcmp.ge.s32.totalorder %v2580_v33, %v2736_v63 }
 0x129   : > { %v5387_v23 = vsel %vm2925_vm7, 4294967295, %v5386_v23  ;;  %vm2941_vm15 = vmand %vm5389_vm6, %vm5388_vm10  ;;  %vm5394_vm6 = vcmp.lt.s32.totalorder %v2629_v47, %v2589_v37  ;;  %vm5395_vm10 = vcmp.ge.s32.totalorder %v2629_v47, %v2587_v36  ;;  %vm5399_vm7 = vcmp.ge.s32.totalorder %v2580_v33, %v2617_v43 }
 0x12a   : > { %v5391_v24 = vsel %vm2941_vm15, 4294967295, %v5390_v24  ;;  %vm2961_vm11 = vmand %vm5395_vm10, %vm5394_vm6  ;;  %vm5405_vm6 = vcmp.ge.s32.totalorder %v2629_v47, %v2589_v37  ;;  %vm5451_vm15 = vcmp.ge.s32.totalorder %v2601_v42, %v2736_v63 }
 0x12b   : > { %5392 = vst [vmem:[#allocation19_spill] sm:$0xff] %v5391_v24  ;;  %v5397_v26 = vsel %vm2961_vm11, 4294967295, %v5396_v26  ;;  %vm2977_vm8 = vmand %vm5399_vm7, %vm5398_vm2  ;;  %vm5408_vm7 = vcmp.lt.s32.totalorder %v2585_v35, %v2795_v7  ;;  %vm5409_vm11 = vcmp.ge.s32.totalorder %v2585_v35, %v2736_v63 }
 0x12c   : > { %v5401_v27 = vsel %vm2977_vm8, 4294967295, %v5400_v27  ;;  %vm3001_vm10 = vmand %vm5405_vm6, %vm5404_vm13  ;;  %vm5420_vm6 = vcmp.lt.s32.totalorder %v2659_v49, %v2589_v37 }
 0x12d   : > { %5402 = vst [vmem:[#allocation21_spill] sm:$0xff] %v5401_v27  ;;  %vm3017_vm8 = vmand %vm5409_vm11, %vm5408_vm7  ;;  %vm5413_vm7 = vcmp.lt.s32.totalorder %v2580_v33, %v2795_v7  ;;  %vm5421_vm11 = vcmp.ge.s32.totalorder %v2659_v49, %v2587_v36 }
 0x12e   : > { %v5411_v31 = vsel %vm3017_vm8, 4294967295, %v5410_v31  ;;  %vm3039_vm14 = vmand %vm5414_vm3, %vm5413_vm7  ;;  %vm5439_vm7 = vcmp.lt.s32.totalorder %v2669_v51, %v2595_v40  ;;  %vm5450_vm8 = vcmp.lt.s32.totalorder %v2601_v42, %v2795_v7 }
 0x12f   : > { %5412 = vst [vmem:[#allocation23_spill] sm:$0xff] %v5411_v31  ;;  %v5416_v41 = vsel %vm3039_vm14, 4294967295, %v5415_v41  ;;  %vm3058_vm13 = vmand %vm5421_vm11, %vm5420_vm6  ;;  %vm5424_vm6 = vcmp.lt.s32.totalorder %v2585_v35, %v2884_v17  ;;  %vm5425_vm11 = vcmp.ge.s32.totalorder %v2585_v35, %v2795_v7  ;;  %vm5461_vm14 = vcmp.ge.s32.totalorder %v2621_v45, %v2595_v40 }
 0x130   : > { %5417 = vst [vmem:[#allocation24_spill] sm:$0xff] %v5416_v41  ;;  %v5423_v52 = vsel %vm3058_vm13, 4294967295, %v5422_v52  ;;  %vm3078_vm2 = vmand %vm5425_vm11, %vm5424_vm6  ;;  %vm5429_vm13 = vcmp.lt.s32.totalorder %v2669_v51, %v2589_v37  ;;  %vm5443_vm6 = vcmp.lt.s32.totalorder %v2593_v39, %v2736_v63  ;;  %vm5444_vm11 = vcmp.ge.s32.totalorder %v2593_v39, %v2617_v43 }
 0x131   : > { %v5427_v55 = vsel %vm3078_vm2, 4294967295, %v5426_v55  ;;  %vm3094_vm5 = vmand %vm5430_vm9, %vm5429_vm13  ;;  %vm5433_vm9 = vcmp.lt.s32.totalorder %v2601_v42, %v2736_v63  ;;  %vm5434_vm13 = vcmp.ge.s32.totalorder %v2601_v42, %v2617_v43  ;;  %vm5460_vm2 = vcmp.lt.s32.totalorder %v2621_v45, %v2617_v43 }
 0x132   : > { %5428 = vst [vmem:[#allocation27_spill] sm:$0xff] %v5427_v55  ;;  %v5432_v59 = vsel %vm3094_vm5, 4294967295, %v5431_v59  ;;  %vm3117_vm3 = vmand %vm5434_vm13, %vm5433_vm9  ;;  %vm5455_vm13 = vcmp.lt.s32.totalorder %v2693_v57, %v2589_v37  ;;  %v5468_v55 = vmov 0 }
 0x133   : > { %vm3142_vm5 = vmand %vm5440_vm4, %vm5439_vm7  ;;  %vm5471_vm4 = vcmp.lt.s32.totalorder %v2659_v49, %v2595_v40  ;;  %vm5472_vm7 = vcmp.ge.s32.totalorder %v2659_v49, %v2589_v37 }
 0x134   : > { %vm3152_vm9 = vmand %vm5444_vm11, %vm5443_vm6  ;;  %vm5484_vm6 = vcmp.lt.s32.totalorder %v2629_v47, %v2617_v43  ;;  %vm5485_vm11 = vcmp.ge.s32.totalorder %v2629_v47, %v2595_v40 }
 0x1db   : > { %v2148_v12 = vpop.f32.mrb[16].mxu0 }
 0x1dc   : > { %v601_v18 = vadd.f32 %v2148_v12, %v2763_v1  ;;  %v595_v19 = vpop.f32.mrb[17].mxu0 }
 0x1dd   : > { %v596_v21 = vadd.f32 %v2763_v1, %v595_v19 }
 0x1de   : > { %v2949_v25 = vmax.f32 %v601_v18, 0.0 }
 0x1df   : > { %v2985_v28 = vmax.f32 %v596_v21, 0.0  ;;  %v2151_v29 = vpop.f32.mrb[18].mxu0  ;;  %v5435_v21 = vmov 0 }
 0x1e0   : > { %5393 = vst [vmem:[#allocation20_spill] sm:$0xff] %v2949_v25  ;;  %v611_v32 = vadd.f32 %v2151_v29, %v2763_v1  ;;  %v605_v34 = vpop.f32.mrb[19].mxu0  ;;  %v5436_v21 = vsel %vm3117_vm3, 4294967295, %v5435_v21  ;;  %vm5546_vm3 = vcmp.lt.s32.totalorder %v2772_v4, %v2595_v40 }
 0x1e1   : > { %5403 = vst [vmem:[#allocation22_spill] sm:$0xff] %v2985_v28  ;;  %v1992_v48 = vpack.c.bf16 %v2949_v25, %v2985_v28  ;;  %v606_v50 = vadd.f32 %v2763_v1, %v605_v34  ;;  %5437 = vst [vmem:[#allocation28_spill] sm:$0xff] %v5436_v21  ;;  %v5441_v34 = vmov 0 }
 0x1e2   : > { %v3082_v56 = vmax.f32 %v611_v32, 0.0  ;;  %v5442_v34 = vsel %vm3142_vm5, 4294967295, %v5441_v34  ;;  %vm3183_vm5 = vmand %vm5451_vm15, %vm5450_vm8  ;;  %vm5456_vm15 = vcmp.ge.s32.totalorder %v2693_v57, %v2587_v36 }
 0x1e3   : > { %v3121_v29 = vmax.f32 %v606_v50, 0.0  ;;  %v2154_v32 = vpop.f32.mrb[20].mxu0  ;;  %1993 = vst [vmem:[%s3125_s12] sm:$0xff] %v1992_v48   ;;  %v5445_v48 = vmov 0  ;;  %vm3202_vm8 = vmand %vm5456_vm15, %vm5455_vm13 }
 0x1e4   : > { %v5446_v48 = vsel %vm3152_vm9, 4294967295, %v5445_v48  ;;  %v621_v18 = vadd.f32 %v2154_v32, %v2763_v1  ;;  %v615_v53 = vpop.f32.mrb[21].mxu0  ;;  %v5452_v32 = vmov 0  ;;  %v5458_v38 = vsel %vm3202_vm8, 4294967295, %v5457_v38  ;;  %vm3219_vm13 = vmand %vm5461_vm14, %vm5460_vm2 }
 0x1e5   : > { %5438 = vst [vmem:[#allocation29_spill] sm:$0xff] %v3121_v29  ;;  %5447 = vst [vmem:[#allocation30_spill] sm:$0xff] %v5446_v48  ;;  %v5453_v32 = vsel %vm3183_vm5, 4294967295, %v5452_v32  ;;  %v1997_v50 = vpack.c.bf16 %v3082_v56, %v3121_v29  ;;  %v616_v12 = vadd.f32 %v2763_v1, %v615_v53  ;;  %vm5466_vm8 = vcmp.lt.s32.totalorder %v2711_v60, %v2589_v37 }
 0x1e6   : > { %5454 = vst [vmem:[#allocation31_spill] sm:$0xff] %v5453_v32  ;;  %v3226_v54 = vmax.f32 %v621_v18, 0.0  ;;  %vm5467_vm14 = vcmp.ge.s32.totalorder %v2711_v60, %v2587_v36  ;;  %vm3320_vm5 = vmand %vm5485_vm11, %vm5484_vm6  ;;  %vm5492_vm6 = vnez %v5397_v26  ;;  %vm5535_vm9 = vcmp.ge.s32.totalorder %v2693_v57, %v2595_v40 }
 0x1e7   : > { %vm3238_vm2 = vmand %vm5467_vm14, %vm5466_vm8  ;;  %v3269_v46 = vmax.f32 %v616_v12, 0.0  ;;  %v2157_v31 = vpop.f32.mrb[0].mxu1  ;;  %2029 = vst [vmem:[%s3125_s12 + $0x8] sm:$0xff] %v1997_v50   ;;  %vm5478_vm14 = vcmp.lt.s32.totalorder %v2711_v60, %v2595_v40  ;;  %v5493_v50 = vsel %vm2705_vm12, %v2949_v25, 0.0  ;;  %vm5498_vm12 = vcmp.lt.s32.totalorder %v2766_v2, %v2589_v37 }
 0x1e8   : > { %5465 = vst [vmem:[#allocation32_spill] sm:$0xff] %v3226_v54  ;;  %v5469_v55 = vsel %vm3238_vm2, 4294967295, %v5468_v55  ;;  %vm3255_vm8 = vmand %vm5472_vm7, %vm5471_vm4  ;;  %vm5479_vm2 = vcmp.ge.s32.totalorder %v2711_v60, %v2589_v37  ;;  %v631_v27 = vadd.f32 %v2157_v31, %v2763_v1  ;;  %v625_v44 = vpop.f32.mrb[1].mxu1 }
 0x1e9   : > { %5477 = vst [vmem:[#allocation33_spill] sm:$0xff] %v3269_v46  ;;  %vm3286_vm15 = vmand %vm5479_vm2, %vm5478_vm14  ;;  %vm5482_vm2 = vnez %v5383_v22  ;;  %vm5483_vm14 = vnez %v5387_v23  ;;  %v1138_v22 = vsel %vm3219_vm13, %v3226_v54, 0.0  ;;  %v2002_v23 = vpack.c.bf16 %v3226_v54, %v3269_v46 }
 0x1ea   : > { %v894_v35 = vsel %vm5482_vm2, %v3226_v54, 0.0  ;;  %v1016_v21 = vsel %vm5483_vm14, %v3226_v54, 0.0  ;;  %v626_v18 = vadd.f32 %v2763_v1, %v625_v44  ;;  %vm5488_vm2 = vcmp.lt.s32.totalorder %v2769_v3, %v2589_v37 }
 0x1eb   : > { %vm5489_vm14 = vcmp.ge.s32.totalorder %v2769_v3, %v2587_v36  ;;  %v893_v53 = vsel %vm5492_vm6, %v3269_v46, 0.0  ;;  %v3347_v44 = vmax.f32 %v5493_v50, %v894_v35  ;;  %v3363_v58 = vmax.f32 %v631_v27, 0.0  ;;  %v2160_v24 = vpop.f32.mrb[2].mxu1  ;;  %2030 = vst [vmem:[%s3125_s12 + $0x10] sm:$0xff] %v2002_v23  }
 0x1ec   : > { %vm3336_vm4 = vmand %vm5489_vm14, %vm5488_vm2  ;;  %vm5494_vm2 = vcmp.lt.s32.totalorder %v2659_v49, %v2617_v43  ;;  %vm5495_vm14 = vcmp.ge.s32.totalorder %v2659_v49, %v2595_v40  ;;  %vm5499_vm6 = vcmp.ge.s32.totalorder %v2766_v2, %v2587_v36  ;;  %v5502_v50 = vsel %vm2721_vm0, %v2985_v28, 0.0 }
 0x1ed   : > { %vm3359_vm7 = vmand %vm5495_vm14, %vm5494_vm2  ;;  %v3379_v32 = vmax.f32 %v5502_v50, %v893_v53  ;;  %vm5503_vm2 = vcmp.lt.s32.totalorder %v2693_v57, %v2595_v40  ;;  %vm5504_vm14 = vcmp.ge.s32.totalorder %v2693_v57, %v2589_v37  ;;  %v1015_v48 = vsel %vm3001_vm10, %v3269_v46, 0.0 }
 0x1ee   : > { %vm3371_vm11 = vmand %vm5499_vm6, %vm5498_vm12  ;;  %vm5507_vm12 = vnez %v5347_v0  ;;  %v3404_v50 = vmax.f32 %v626_v18, 0.0  ;;  %vm5511_vm10 = vcmp.ge.s32.totalorder %v2766_v2, %v2589_v37  ;;  %vm5515_vm0 = vcmp.ge.s32.totalorder %v2769_v3, %v2589_v37 }
 0x1ef   : > { %vm3387_vm13 = vmand %vm5504_vm14, %vm5503_vm2  ;;  %v5508_v61 = vsel %vm5507_vm12, %v2949_v25, 0.0  ;;  %vm5510_vm2 = vcmp.lt.s32.totalorder %v2766_v2, %v2595_v40  ;;  %vm5514_vm12 = vcmp.lt.s32.totalorder %v2769_v3, %v2595_v40  ;;  %v1137_v23 = vsel %vm3320_vm5, %v3269_v46, 0.0 }
 0x1f0   : > { %v3398_v53 = vmax.f32 %v5508_v61, %v1016_v21  ;;  %5509 = vst [vmem:[#allocation34_spill] sm:$0xff] %v3404_v50  ;;  %vm3413_vm14 = vmand %vm5511_vm10, %vm5510_vm2  ;;  %v5518_v21 = vsel %vm2731_vm1, %v2985_v28, 0.0  ;;  %vm5519_vm2 = vnez %v5362_v11  ;;  %v641_v62 = vadd.f32 %v2160_v24, %v2763_v1 }
 0x1f1   : > { %vm3423_vm6 = vmand %vm5515_vm0, %vm5514_vm12  ;;  %v3431_v18 = vmax.f32 %v5518_v21, %v1015_v48  ;;  %v5520_v61 = vsel %vm5519_vm2, %v2949_v25, 0.0  ;;  %v635_v48 = vpop.f32.mrb[3].mxu1  ;;  %vm5522_vm1 = vnez %v5423_v52  ;;  %v1018_v11 = vsel %vm3255_vm8, %v3363_v58, 0.0 }
 0x1f2   : > { %v3440_v54 = vmax.f32 %v5520_v61, %v1138_v22  ;;  %v896_v31 = vsel %vm5522_vm1, %v3363_v58, 0.0  ;;  %vm5523_vm5 = vcmp.lt.s32.totalorder %v2669_v51, %v2617_v43  ;;  %vm5524_vm12 = vcmp.ge.s32.totalorder %v2669_v51, %v2595_v40 }
 0x1f3   : > { %vm3459_vm2 = vmand %vm5524_vm12, %vm5523_vm5  ;;  %v2007_v52 = vpack.c.bf16 %v3363_v58, %v3404_v50  ;;  %v636_v19 = vadd.f32 %v2763_v1, %v635_v48  ;;  %vm5527_vm5 = vcmp.lt.s32.totalorder %v2772_v4, %v2589_v37  ;;  %vm5528_vm12 = vcmp.ge.s32.totalorder %v2772_v4, %v2587_v36 }
 0x1f4   : > { %5521 = vst [vmem:[#allocation35_spill] sm:$0xff] %v3440_v54  ;;  %vm3483_vm1 = vmand %vm5528_vm12, %vm5527_vm5  ;;  %v5529_v21 = vmov 0  ;;  %vm5531_vm8 = vnez %v5432_v59  ;;  %vm5532_vm10 = vnez %v5351_v5  ;;  %vm5534_vm0 = vcmp.lt.s32.totalorder %v2693_v57, %v2617_v43  ;;  %v2163_v54 = vpop.f32.mrb[4].mxu1 }
 0x1f5   : > { %v5530_v21 = vsel %vm3483_vm1, 4294967295, %v5529_v21  ;;  %v895_v61 = vsel %vm5531_vm8, %v3404_v50, 0.0  ;;  %v5533_v24 = vsel %vm5532_vm10, %v3082_v56, 0.0  ;;  %vm3502_vm5 = vmand %vm5535_vm9, %vm5534_vm0  ;;  %v5536_v48 = vmov 0  ;;  %2031 = vst [vmem:[%s3125_s12 + $0x18] sm:$0xff] %v2007_v52  }
 0x1f6   : > { %v3494_v25 = vmax.f32 %v5533_v24, %v896_v31  ;;  %v5537_v48 = vsel %vm3502_vm5, 4294967295, %v5536_v48  ;;  %v3514_v5 = vmax.f32 %v641_v62, 0.0  ;;  %vm5540_vm9 = vcmp.lt.s32.totalorder %v2801_v8, %v2589_v37 }
 0x1f7   : > { %5538 = vst [vmem:[#allocation36_spill] sm:$0xff] %v5537_v48  ;;  %vm5541_vm0 = vcmp.ge.s32.totalorder %v2801_v8, %v2587_v36  ;;  %v5542_v59 = vmov 0  ;;  %vm5544_vm12 = vnez %v5367_v14  ;;  %vm5547_vm8 = vcmp.ge.s32.totalorder %v2772_v4, %v2589_v37 }
 0x1f8   : > { %5539 = vst [vmem:[#allocation37_spill] sm:$0xff] %v3514_v5  ;;  %vm3522_vm1 = vmand %vm5541_vm0, %vm5540_vm9  ;;  %v5545_v31 = vsel %vm5544_vm12, %v3121_v29, 0.0  ;;  %v5548_v62 = vmov 0  ;;  %vm5550_vm9 = vnez %v5442_v34  ;;  %vm5551_vm0 = vnez %v5359_v10 }
 0x1f9   : > { %v5543_v59 = vsel %vm3522_vm1, 4294967295, %v5542_v59  ;;  %v3530_v24 = vmax.f32 %v5545_v31, %v895_v61  ;;  %vm3538_vm10 = vmand %vm5547_vm8, %vm5546_vm3  ;;  %v1017_v46 = vsel %vm5550_vm9, %v3404_v50, 0.0  ;;  %v5552_v14 = vsel %vm5551_vm0, %v3082_v56, 0.0 }
 0x1fa   : > { %v5549_v62 = vsel %vm3538_vm10, 4294967295, %v5548_v62  ;;  %v3549_v61 = vmax.f32 %v5552_v14, %v1018_v11  ;;  %v3555_v31 = vmax.f32 %v636_v19, 0.0  ;;  %vm5553_vm3 = vcmp.lt.s32.totalorder %v2801_v8, %v2595_v40 }
 0x1fb   : > { %vm5554_vm8 = vcmp.ge.s32.totalorder %v2801_v8, %v2589_v37  ;;  %v5555_v10 = vmov 0  ;;  %vm5557_vm0 = vnez %v5371_v15  ;;  %vm5559_vm12 = vcmp.lt.s32.totalorder %v2711_v60, %v2617_v43 }
 0x1fc   : > { %vm3564_vm9 = vmand %vm5554_vm8, %vm5553_vm3  ;;  %v5558_v34 = vsel %vm5557_vm0, %v3121_v29, 0.0  ;;  %vm5560_vm1 = vcmp.ge.s32.totalorder %v2711_v60, %v2595_v40  ;;  %v1139_v19 = vsel %vm3459_vm2, %v3404_v50, 0.0  ;;  %vm5563_vm3 = vnez %v5354_v6 }
 0x1fd   : > { %v5556_v10 = vsel %vm3564_vm9, 4294967295, %v5555_v10  ;;  %v3572_v11 = vmax.f32 %v5558_v34, %v1017_v46  ;;  %vm3580_vm10 = vmand %vm5560_vm1, %vm5559_vm12  ;;  %v5564_v15 = vsel %vm5563_vm3, %v2985_v28, 0.0  ;;  %v651_v14 = vadd.f32 %v2163_v54, %v2763_v1  ;;  %v645_v34 = vpop.f32.mrb[5].mxu1 }
 0x1fe   : > { %v3591_v46 = vmax.f32 %v5564_v15, %v1137_v23  ;;  %vm5565_vm1 = vnez %v5458_v38  ;;  %v1020_v6 = vsel %vm3387_vm13, %v3514_v5, 0.0  ;;  %vm5566_vm2 = vcmp.lt.s32.totalorder %v2766_v2, %v2617_v43  ;;  %v2166_v12 = vpop.f32.mrb[6].mxu1 }
 0x1ff   : > { %v898_v22 = vsel %vm5565_vm1, %v3514_v5, 0.0  ;;  %vm5567_vm12 = vcmp.ge.s32.totalorder %v2766_v2, %v2595_v40  ;;  %v2012_v38 = vpack.c.bf16 %v3514_v5, %v3555_v31  ;;  %v646_v27 = vadd.f32 %v2763_v1, %v645_v34 }
 0x200   : > { %vm3610_vm3 = vmand %vm5567_vm12, %vm5566_vm2  ;;  %vm5570_vm2 = vcmp.lt.s32.totalorder %v2804_v9, %v2589_v37  ;;  %vm5571_vm12 = vcmp.ge.s32.totalorder %v2804_v9, %v2587_v36  ;;  %v5572_v15 = vmov 0  ;;  %vm5574_vm1 = vnez %v5469_v55 }
 0x201   : > { %vm3630_vm8 = vmand %vm5571_vm12, %vm5570_vm2  ;;  %v897_v54 = vsel %vm5574_vm1, %v3555_v31, 0.0  ;;  %v3638_v28 = vmax.f32 %v3347_v44, %v898_v22  ;;  %vm5575_vm13 = vcmp.lt.s32.totalorder %v2804_v9, %v2595_v40  ;;  %vm5576_vm0 = vcmp.ge.s32.totalorder %v2804_v9, %v2589_v37  ;;  %2032 = vst [vmem:[%s3125_s12 + $0x20] sm:$0xff] %v2012_v38  }
 0x202   : > { %v5573_v15 = vsel %vm3630_vm8, 4294967295, %v5572_v15  ;;  %vm3646_vm5 = vmand %vm5576_vm0, %vm5575_vm13  ;;  %v5577_v34 = vmov 0  ;;  %vm5579_vm2 = vcmp.lt.s32.totalorder %v2769_v3, %v2617_v43  ;;  %vm5580_vm1 = vcmp.ge.s32.totalorder %v2769_v3, %v2595_v40 }
 0x203   : > { %v5578_v34 = vsel %vm3646_vm5, 4294967295, %v5577_v34  ;;  %vm3656_vm12 = vmand %vm5580_vm1, %vm5579_vm2  ;;  %v3664_v44 = vmax.f32 %v651_v14, 0.0  ;;  %vm5583_vm0 = vcmp.lt.s32.totalorder %v2839_v13, %v2589_v37  ;;  %vm5584_vm13 = vcmp.ge.s32.totalorder %v2839_v13, %v2587_v36 }
 0x204   : > { %vm3672_vm5 = vmand %vm5584_vm13, %vm5583_vm0  ;;  %v3677_v50 = vmax.f32 %v3379_v32, %v897_v54  ;;  %vm5587_vm2 = vcmp.lt.s32.totalorder %v2839_v13, %v2595_v40  ;;  %vm5588_vm1 = vcmp.ge.s32.totalorder %v2839_v13, %v2589_v37  ;;  %v5589_v14 = vmov 0 }
 0x205   : > { %vm3685_vm8 = vmand %vm5588_vm1, %vm5587_vm2  ;;  %v1019_v36 = vsel %vm3286_vm15, %v3555_v31, 0.0  ;;  %v3693_v5 = vmax.f32 %v3398_v53, %v1020_v6  ;;  %vm5591_vm0 = vcmp.lt.s32.totalorder %v2801_v8, %v2617_v43  ;;  %vm5592_vm13 = vcmp.ge.s32.totalorder %v2801_v8, %v2595_v40 }
 0x206   : > { %v5590_v14 = vsel %vm3685_vm8, 4294967295, %v5589_v14  ;;  %vm3701_vm9 = vmand %vm5592_vm13, %vm5591_vm0  ;;  %v3709_v37 = vmax.f32 %v646_v27, 0.0  ;;  %v3713_v53 = vmax.f32 %v3431_v18, %v1019_v36  ;;  %vm5595_vm15 = vcmp.lt.s32.totalorder %v2772_v4, %v2617_v43  ;;  %v655_v36 = vpop.f32.mrb[7].mxu1 }
 0x207   : > { %vm5596_vm0 = vcmp.ge.s32.totalorder %v2772_v4, %v2595_v40  ;;  %vm5599_vm2 = vnez %v5375_v16  ;;  %v661_v27 = vadd.f32 %v2166_v12, %v2763_v1  ;;  %v900_v48 = vsel %vm3336_vm4, %v3664_v44, 0.0 }
 0x208   : > { %vm3721_vm13 = vmand %vm5596_vm0, %vm5595_vm15  ;;  %v5600_v38 = vsel %vm5599_vm2, %v3121_v29, 0.0  ;;  %v1022_v16 = vsel %vm3423_vm6, %v3664_v44, 0.0  ;;  %vm5601_vm2 = vcmp.lt.s32.totalorder %v2839_v13, %v2617_v43  ;;  %vm5602_vm15 = vcmp.ge.s32.totalorder %v2839_v13, %v2595_v40 }
 0x209   : > { %v3732_v18 = vmax.f32 %v5600_v38, %v1139_v19  ;;  %vm3751_vm0 = vmand %vm5602_vm15, %vm5601_vm2  ;;  %v2017_v41 = vpack.c.bf16 %v3664_v44, %v3709_v37  ;;  %v656_v30 = vadd.f32 %v2763_v1, %v655_v36  ;;  %v899_v38 = vsel %vm3371_vm11, %v3709_v37, 0.0 }
 0x20a   : > { %v3769_v54 = vmax.f32 %v3494_v25, %v900_v48  ;;  %vm5605_vm2 = vcmp.lt.s32.totalorder %v2804_v9, %v2617_v43  ;;  %vm5606_vm15 = vcmp.ge.s32.totalorder %v2804_v9, %v2595_v40  ;;  %v3785_v35 = vmax.f32 %v661_v27, 0.0 }
 0x20b   : > { %vm3777_vm4 = vmand %vm5606_vm15, %vm5605_vm2  ;;  %v3788_v25 = vmax.f32 %v3530_v24, %v899_v38  ;;  %v1021_v48 = vsel %vm3413_vm14, %v3709_v37, 0.0  ;;  %v3794_v40 = vmax.f32 %v3549_v61, %v1022_v16  ;;  %vm5610_vm2 = vcmp.lt.s32.totalorder %v2629_v47, %v2736_v63  ;;  %v2169_v24 = vpop.f32.mrb[8].mxu1  ;;  %2033 = vst [vmem:[%s3125_s12 + $0x28] sm:$0xff] %v2017_v41  }
 0x20c   : > { %5609 = vst [vmem:[#allocation38_spill] sm:$0xff] %v3785_v35  ;;  %vm5611_vm15 = vcmp.ge.s32.totalorder %v2629_v47, %v2617_v43  ;;  %v5612_v36 = vmov 0  ;;  %v3814_v0 = vmax.f32 %v656_v30, 0.0  ;;  %v3818_v61 = vmax.f32 %v3572_v11, %v1021_v48  ;;  %v665_v41 = vpop.f32.mrb[9].mxu1 }
 0x20d   : > { %vm3802_vm6 = vmand %vm5611_vm15, %vm5610_vm2  ;;  %v5615_v16 = vsel %vm3359_vm7, %v3363_v58, 0.0  ;;  %vm5616_vm2 = vnez %v5379_v20  ;;  %vm5618_vm15 = vcmp.lt.s32.totalorder %v2621_v45, %v2736_v63  ;;  %vm5619_vm1 = vcmp.ge.s32.totalorder %v2621_v45, %v2617_v43 }
 0x20e   : > { %v5613_v36 = vsel %vm3802_vm6, 4294967295, %v5612_v36  ;;  %5614 = vst [vmem:[#allocation39_spill] sm:$0xff] %v3814_v0  ;;  %v5617_v38 = vsel %vm5616_vm2, %v3082_v56, 0.0  ;;  %vm3839_vm8 = vmand %vm5619_vm1, %vm5618_vm15  ;;  %v5620_v11 = vmov 0  ;;  %vm5622_vm11 = vcmp.lt.s32.totalorder %v2669_v51, %v2736_v63 }
 0x20f   : > { %v3831_v29 = vmax.f32 %v5617_v38, %v5615_v16  ;;  %v5621_v11 = vsel %vm3839_vm8, 4294967295, %v5620_v11  ;;  %vm5623_vm7 = vcmp.ge.s32.totalorder %v2669_v51, %v2617_v43  ;;  %v5624_v20 = vmov 0 }
 0x210   : > { %vm3849_vm14 = vmand %vm5623_vm7, %vm5622_vm11  ;;  %v671_v26 = vadd.f32 %v2169_v24, %v2763_v1  ;;  %vm5626_vm15 = vnez %v5530_v21  ;;  %vm5627_vm11 = vnez %v5549_v62  ;;  %vm5628_vm7 = vcmp.lt.s32.totalorder %v2659_v49, %v2736_v63 }
 0x211   : > { %v5625_v20 = vsel %vm3849_vm14, 4294967295, %v5624_v20  ;;  %v902_v30 = vsel %vm5626_vm15, %v3785_v35, 0.0  ;;  %v1024_v48 = vsel %vm5627_vm11, %v3785_v35, 0.0  ;;  %vm5629_vm2 = vcmp.ge.s32.totalorder %v2659_v49, %v2617_v43 }
 0x212   : > { %vm3873_vm1 = vmand %vm5629_vm2, %vm5628_vm7  ;;  %vm5632_vm15 = vcmp.lt.s32.totalorder %v2711_v60, %v2736_v63  ;;  %vm5633_vm11 = vcmp.ge.s32.totalorder %v2711_v60, %v2617_v43  ;;  %v5634_v21 = vmov 0  ;;  %v2022_v62 = vpack.c.bf16 %v3785_v35, %v3814_v0 }
 0x213   : > { %vm3883_vm14 = vmand %vm5633_vm11, %vm5632_vm15  ;;  %v666_v38 = vadd.f32 %v2763_v1, %v665_v41  ;;  %vm5637_vm15 = vnez %v5543_v59  ;;  %v3904_v27 = vmax.f32 %v3638_v28, %v902_v30  ;;  %vm5638_vm11 = vcmp.lt.s32.totalorder %v2693_v57, %v2736_v63 }
 0x214   : > { %v5635_v21 = vsel %vm3883_vm14, 4294967295, %v5634_v21  ;;  %v901_v16 = vsel %vm5637_vm15, %v3814_v0, 0.0  ;;  %vm5639_vm6 = vcmp.ge.s32.totalorder %v2693_v57, %v2617_v43  ;;  %v3924_v1 = vmax.f32 %v671_v26, 0.0  ;;  %2034 = vst [vmem:[%s3125_s12 + $0x30] sm:$0xff] %v2022_v62  }
 0x215   : > { %5636 = vst [vmem:[#allocation40_spill] sm:$0xff] %v5635_v21  ;;  %vm3912_vm7 = vmand %vm5639_vm6, %vm5638_vm11  ;;  %v5640_v21 = vmov 0  ;;  %v3927_v28 = vmax.f32 %v3677_v50, %v901_v16  ;;  %vm5642_vm6 = vnez %v5556_v10  ;;  %v3933_v41 = vmax.f32 %v3693_v5, %v1024_v48 }
 0x216   : > { %v5641_v21 = vsel %vm3912_vm7, 4294967295, %v5640_v21  ;;  %v1023_v59 = vsel %vm5642_vm6, %v3814_v0, 0.0  ;;  %vm5643_vm11 = vcmp.lt.s32.totalorder %v2766_v2, %v2736_v63  ;;  %vm5644_vm15 = vcmp.ge.s32.totalorder %v2766_v2, %v2617_v43 }
 0x217   : > { %vm3941_vm8 = vmand %vm5644_vm15, %vm5643_vm11  ;;  %v5645_v30 = vmov 0  ;;  %v3953_v50 = vmax.f32 %v666_v38, 0.0  ;;  %v3957_v5 = vmax.f32 %v3713_v53, %v1023_v59  ;;  %v5648_v26 = vsel %vm3580_vm10, %v3555_v31, 0.0 }
 0x218   : > { %v5646_v30 = vsel %vm3941_vm8, 4294967295, %v5645_v30  ;;  %v3967_v48 = vmax.f32 %v3591_v46, %v5648_v26  ;;  %vm5649_vm15 = vcmp.lt.s32.totalorder %v2769_v3, %v2736_v63  ;;  %vm5650_vm11 = vcmp.ge.s32.totalorder %v2769_v3, %v2617_v43 }
 0x219   : > { %5647 = vst [vmem:[#allocation41_spill] sm:$0xff] %v3953_v50  ;;  %vm3975_vm2 = vmand %vm5650_vm11, %vm5649_vm15  ;;  %v5651_v53 = vmov 0  ;;  %vm5653_vm10 = vnez %v5573_v15  ;;  %vm5654_vm15 = vnez %v5578_v34  ;;  %vm5655_vm11 = vcmp.lt.s32.totalorder %v2801_v8, %v2736_v63 }
 0x21a   : > { %v5652_v53 = vsel %vm3975_vm2, 4294967295, %v5651_v53  ;;  %v904_v52 = vsel %vm5653_vm10, %v3924_v1, 0.0  ;;  %v1026_v16 = vsel %vm5654_vm15, %v3924_v1, 0.0  ;;  %vm5656_vm7 = vcmp.ge.s32.totalorder %v2801_v8, %v2617_v43 }
 0x21b   : > { %vm4007_vm14 = vmand %vm5656_vm7, %vm5655_vm11  ;;  %v2027_v34 = vpack.c.bf16 %v3924_v1, %v3953_v50  ;;  %v903_v38 = vsel %vm3672_vm5, %v3953_v50, 0.0  ;;  %v4029_v59 = vmax.f32 %v3769_v54, %v904_v52  ;;  %vm5659_vm11 = vnez %v5590_v14 }
 0x21c   : > { %v1025_v26 = vsel %vm5659_vm11, %v3953_v50, 0.0  ;;  %vm5660_vm8 = vcmp.lt.s32.totalorder %v2593_v39, %v2795_v7  ;;  %vm5661_vm7 = vcmp.ge.s32.totalorder %v2593_v39, %v2736_v63  ;;  %v5662_v46 = vmov 0 }
 0x21d   : > { %vm4040_vm15 = vmand %vm5661_vm7, %vm5660_vm8  ;;  %v4049_v22 = vmax.f32 %v3788_v25, %v903_v38  ;;  %v4052_v14 = vmax.f32 %v3818_v61, %v1025_v26  ;;  %v4055_v54 = vmax.f32 %v3794_v40, %v1026_v16  ;;  %vm5665_vm8 = vcmp.lt.s32.totalorder %v2772_v4, %v2736_v63  ;;  %2035 = vst [vmem:[%s3125_s12 + $0x38] sm:$0xff] %v2027_v34   ;;  %v5669_v61 = vld [vmem:[#allocation36_spill] sm:$0xff]  ;;  %v5671_v16 = vld [vmem:[#allocation37_spill] sm:$0xff] }
 0x21e   : > { %v5663_v46 = vsel %vm4040_vm15, 4294967295, %v5662_v46  ;;  %vm5666_vm7 = vcmp.ge.s32.totalorder %v2772_v4, %v2617_v43  ;;  %v1147_v40 = vsel %vm3751_vm0, %v3953_v50, 0.0  ;;  %v5673_v26 = vld [vmem:[#allocation35_spill] sm:$0xff]  ;;  %v5674_v62 = vsel %vm3610_vm3, %v3709_v37, 0.0 }
 0x21f   : > { %5664 = vst [vmem:[#allocation42_spill] sm:$0xff] %v5663_v46  ;;  %vm4065_vm11 = vmand %vm5666_vm7, %vm5665_vm8  ;;  %vm5670_vm8 = vnez %v5669_v61  ;;  %v1155_v10 = vmax.f32 %v3732_v18, %v5674_v62  ;;  %v5675_v34 = vsel %vm3656_vm12, %v3664_v44, 0.0  ;;  %vm5676_vm0 = vcmp.lt.s32.totalorder %v2839_v13, %v2736_v63 }
 0x220   : > { %v5672_v38 = vsel %vm5670_vm8, %v5671_v16, 0.0  ;;  %v1156_v19 = vmax.f32 %v3831_v29, %v5675_v34  ;;  %vm5677_vm7 = vcmp.ge.s32.totalorder %v2839_v13, %v2617_v43 }
 0x221   : > { %v1154_v52 = vmax.f32 %v5673_v26, %v5672_v38  ;;  %vm4102_vm8 = vmand %vm5677_vm7, %vm5676_vm0 }
 0x222   : > { %2294 = shalt.err (!%p2291_p8)
}
 0x223   : > { %s2295_s27 = scalar_lea.hbm %s3986_s22, 1024  ;;  %s2299_s18 = scalar_lea.hbm %s5249_s6, 4096 }
 0x224   : > { %p2296_p9 = scmp.ne.s32.totalorder %s3986_s22, %s2295_s27  ;;  %p2300_p0 = scmp.lt.u32.totalorder %s3986_s22, %s5249_s6 }
 0x225   : > { %p2301_p1 = scmp.lt.u32.totalorder %s2299_s18, %s2295_s27  ;;  %p2303_p3 = scmp.lt.u32.totalorder %s2295_s27, %s3986_s22 }
 0x226   : > { %p2297_p12 = pnand %p2296_p9, %p2465_p10 }
 0x227   : > { %p2302_p2 = por %p2301_p1, %p2300_p0 }
 0x228   : > { %p2298_p13 = pneg %p2297_p12 }
 0x229   : > { %p2304_p4 = por %p2303_p3, %p2302_p2 }
 0x22b   : > { %p2305_p5 = pnand %p2304_p4, %p2298_p13 }
 0x22d   : > { %2308 = shalt.err (!%p2305_p5)
}
 0x22e   : > { %s2381_s21 = smov 64   ;;  %s2382_s24 = smov 4   ;;  %v918_v29 = vmax.f32 %v4049_v22, %v4029_v59  ;;  %v1040_v23 = vmax.f32 %v4052_v14, %v4055_v54  ;;  %v5680_v55 = vsel %vm3701_vm9, %v3814_v0, 0.0  ;;  %vm5681_vm12 = vcmp.lt.s32.totalorder %v2804_v9, %v2736_v63  ;;  %v5687_v54 = vld [vmem:[#allocation33_spill] sm:$0xff]  ;;  %v5699_v26 = vld [vmem:[#allocation32_spill] sm:$0xff]  ;;  %v5925_v6 = vld [vmem:[#allocation27_spill] sm:$0xff] }
 0x22f   : > { %2222 = dma.vmem_to_hbm [thread:$0]  (%p2465_p10), %s3988_s17, 1024, %s3986_s22, %s1782_s23, %s2381_s21, %s2381_s21, %s2382_s24   ;;  %v1157_v18 = vmax.f32 %v3967_v48, %v5680_v55  ;;  %vm5682_vm0 = vcmp.ge.s32.totalorder %v2804_v9, %v2617_v43  ;;  %v5685_v43 = vsel %vm3721_vm13, %v3785_v35, 0.0  ;;  %v1159_v48 = vmax.f32 %v1155_v10, %v1147_v40  ;;  %v5748_v61 = vld [vmem:[#allocation25_spill] sm:$0xff] }
 0x230   : > { %vm4149_vm7 = vmand %vm5682_vm0, %vm5681_vm12  ;;  %v1158_v32 = vmax.f32 %v1154_v52, %v5685_v43  ;;  %v5686_v22 = vsel %vm3777_vm4, %v3924_v1, 0.0  ;;  %vm5688_vm2 = vnez %v5613_v36  ;;  %vm5689_vm9 = vcmp.lt.s32.totalorder %v2629_v47, %v2795_v7  ;;  %s1912_s17 = sshll.u32 %s2798_s28, 3  ;;  %s5199_s27 = scalar_lea.hbm %s5250_s7, %s1949_s13 }
 0x231   : > { %v1160_v14 = vmax.f32 %v1156_v19, %v5686_v22  ;;  %v1259_v38 = vsel %vm5688_vm2, %v5687_v54, 0.0  ;;  %vm5690_vm0 = vcmp.ge.s32.totalorder %v2629_v47, %v2736_v63  ;;  %vm5693_vm13 = vcmp.lt.s32.totalorder %v2621_v45, %v2795_v7  ;;  %v5701_v19 = vld [vmem:[#allocation34_spill] sm:$0xff]  ;;  %s4613_s22 = scalar_lea.vmem [#allocation6], %s1912_s17  ;;  %s1787_s10 = scalar_lea.sflag [#allocation7], %s2798_s28 }
 0x232   : > { %vm4185_vm12 = vmand %vm5690_vm0, %vm5689_vm9  ;;  %vm5694_vm4 = vcmp.ge.s32.totalorder %v2621_v45, %v2736_v63  ;;  %v5697_v36 = vmax.f32 %v3927_v28, %v3904_v27  ;;  %v5698_v52 = vmax.f32 %v3957_v5, %v3933_v41  ;;  %vm5703_vm6 = vcmp.lt.s32.totalorder %v2669_v51, %v2795_v7  ;;  %v5707_v41 = vld [vmem:[#allocation40_spill] sm:$0xff]  ;;  %s1816_s23 = sshll.u32 %s4613_s22, 4  ;;  %s2383_s18 = smov [#allocation6]   ;;  %s5201_s23 = int_to_ptr.vmem [resolvable:$true] %s1816_s23 }
 0x233   : > { %vm4195_vm3 = vmand %vm5694_vm4, %vm5693_vm13  ;;  %vm5700_vm13 = vnez %v5621_v11  ;;  %vm5702_vm4 = vnez %v5625_v20  ;;  %vm5704_vm0 = vcmp.ge.s32.totalorder %v2669_v51, %v2736_v63  ;;  %v1161_v11 = vmax.f32 %v1157_v18, %v1158_v32  ;;  %s2309_s12 = scalar_lea.vmem %s5201_s23, 128  ;;  %s2313_s19 = sshll.u32 %s2383_s18, 4  ;;  %s2314_s19 = int_to_ptr.vmem [resolvable:$false] %s2313_s19 }
 0x234   : > { %v919_v10 = vmax.f32 %v5697_v36, %v918_v29  ;;  %v1041_v40 = vmax.f32 %v5698_v52, %v1040_v23  ;;  %v1260_v34 = vsel %vm5700_vm13, %v5699_v26, 0.0  ;;  %v1261_v55 = vsel %vm5702_vm4, %v5701_v19, 0.0  ;;  %vm4225_vm2 = vmand %vm5704_vm0, %vm5703_vm6  ;;  %p2310_p6 = scmp.ne.s32.totalorder %s5201_s23, %s2309_s12  ;;  %s2315_s9 = scalar_lea.vmem %s2314_s19, 256 }
 0x235   : > { %v1162_v20 = vmax.f32 %v1159_v48, %v1160_v14  ;;  %v1262_v28 = vsel %vm3873_vm1, %v3363_v58, 0.0  ;;  %vm5708_vm6 = vnez %v5707_v41  ;;  %vm5709_vm0 = vcmp.lt.s32.totalorder %v2659_v49, %v2795_v7  ;;  %v5740_v41 = vld [vmem:[#allocation22_spill] sm:$0xff]  ;;  %p2316_p9 = scmp.lt.s32.totalorder %s5201_s23, %s2314_s19  ;;  %p2317_p12 = scmp.lt.s32.totalorder %s2315_s9, %s2309_s12 }
 0x236   : > { %v1263_v5 = vsel %vm5708_vm6, %v3555_v31, 0.0  ;;  %vm5710_vm13 = vcmp.ge.s32.totalorder %v2659_v49, %v2736_v63  ;;  %vm5713_vm4 = vcmp.lt.s32.totalorder %v2711_v60, %v2795_v7  ;;  %vm5714_vm1 = vcmp.ge.s32.totalorder %v2711_v60, %v2736_v63  ;;  %p2311_p7 = pnand %p2310_p6, %p2465_p10 }
 0x237   : > { %vm4249_vm9 = vmand %vm5710_vm13, %vm5709_vm0  ;;  %v5715_v24 = vmov 0  ;;  %v920_v23 = vrot.slane %v919_v10, 4  ;;  %v1042_v18 = vrot.slane %v1041_v40, 4  ;;  %vm5717_vm13 = vnez %v5641_v21  ;;  %p2318_p13 = por %p2317_p12, %p2316_p9 }
 0x238   : > { %vm4259_vm5 = vmand %vm5714_vm1, %vm5713_vm4  ;;  %v1264_v43 = vsel %vm5717_vm13, %v5671_v16, 0.0  ;;  %vm5718_vm0 = vnez %v5646_v30  ;;  %vm5719_vm4 = vcmp.lt.s32.totalorder %v2693_v57, %v2795_v7  ;;  %vm5720_vm1 = vcmp.ge.s32.totalorder %v2693_v57, %v2736_v63  ;;  %p2312_p8 = pneg %p2311_p7 }
 0x239   : > { %v5716_v24 = vsel %vm4259_vm5, 4294967295, %v5715_v24  ;;  %v1265_v32 = vsel %vm5718_vm0, %v3709_v37, 0.0  ;;  %vm4279_vm6 = vmand %vm5720_vm1, %vm5719_vm4  ;;  %vm5723_vm10 = vcmp.lt.s32.totalorder %v2766_v2, %v2795_v7  ;;  %vm5724_vm13 = vcmp.ge.s32.totalorder %v2766_v2, %v2736_v63 }
 0x23a   : > { %vm4289_vm15 = vmand %vm5724_vm13, %vm5723_vm10  ;;  %v1163_v30 = vmax.f32 %v1161_v11, %v1162_v20  ;;  %vm5727_vm4 = vnez %v5652_v53  ;;  %v1267_v14 = vsel %vm4007_vm14, %v3814_v0, 0.0  ;;  %v1268_v36 = vsel %vm4065_vm11, %v3785_v35, 0.0  ;;  %v5738_v20 = vld [vmem:[#allocation19_spill] sm:$0xff]  ;;  %p2319_p0 = pnand %p2318_p13, %p2312_p8 }
 0x23b   : > { %v1266_v22 = vsel %vm5727_vm4, %v3664_v44, 0.0  ;;  %vm5728_vm10 = vcmp.lt.s32.totalorder %v2769_v3, %v2795_v7  ;;  %vm5729_vm1 = vcmp.ge.s32.totalorder %v2769_v3, %v2736_v63  ;;  %v5730_v52 = vmov 0 }
 0x23c   : > { %vm4312_vm13 = vmand %vm5729_vm1, %vm5728_vm10  ;;  %vm5733_vm4 = vcmp.lt.s32.totalorder %v2801_v8, %v2795_v7  ;;  %vm5734_vm14 = vcmp.ge.s32.totalorder %v2801_v8, %v2736_v63  ;;  %v5735_v53 = vmov 0  ;;  %v921_v15 = vmax.f32 %v919_v10, %v920_v23  ;;  %v5747_v10 = vld [vmem:[#allocation12_spill] sm:$0xff] }
 0x23d   : > { %v5731_v52 = vsel %vm4312_vm13, 4294967295, %v5730_v52  ;;  %vm4322_vm0 = vmand %vm5734_vm14, %vm5733_vm4  ;;  %v1043_v25 = vmax.f32 %v1041_v40, %v1042_v18  ;;  %v1269_v11 = vsel %vm4102_vm8, %v3953_v50, 0.0  ;;  %vm5739_vm10 = vnez %v5738_v20  ;;  %v5751_v40 = vld [vmem:[#allocation20_spill] sm:$0xff]  ;;  %v5755_v50 = vld [vmem:[#allocation29_spill] sm:$0xff] }
 0x23e   : > { %5732 = vst [vmem:[#allocation36_spill] sm:$0xff] %v5731_v52  ;;  %v5736_v53 = vsel %vm4322_vm0, 4294967295, %v5735_v53  ;;  %v5741_v59 = vsel %vm5739_vm10, %v5740_v41, 0.0  ;;  %vm5742_vm1 = vcmp.lt.s32.totalorder %v2772_v4, %v2795_v7  ;;  %vm5743_vm4 = vcmp.ge.s32.totalorder %v2772_v4, %v2736_v63  ;;  %v5753_v20 = vld [vmem:[#allocation28_spill] sm:$0xff] }
 0x23f   : > { %5737 = vst [vmem:[#allocation37_spill] sm:$0xff] %v5736_v53  ;;  %v1271_v46 = vmax.f32 %v5741_v59, %v1259_v38  ;;  %vm4343_vm14 = vmand %vm5743_vm4, %vm5742_vm1  ;;  %v5744_v35 = vmov 0  ;;  %v1164_v59 = vrot.slane %v1163_v30, 4  ;;  %v5749_v38 = vld [vmem:[#allocation21_spill] sm:$0xff]  ;;  %vm5754_vm1 = vnez %v5753_v20  ;;  %v5757_v53 = vld [vmem:[#allocation30_spill] sm:$0xff] }
 0x240   : > { %v5745_v35 = vsel %vm4343_vm14, 4294967295, %v5744_v35  ;;  %vm5750_vm0 = vnez %v5749_v38  ;;  %v5756_v41 = vsel %vm5754_vm1, %v5755_v50, 0.0  ;;  %vm5758_vm4 = vnez %v5757_v53 }
 0x241   : > { %5746 = vst [vmem:[#allocation35_spill] sm:$0xff] %v5745_v35  ;;  %v5752_v23 = vsel %vm5750_vm0, %v5751_v40, 0.0  ;;  %v1273_v35 = vmax.f32 %v5756_v41, %v1261_v55  ;;  %v5759_v0 = vsel %vm5758_vm4, %v3082_v56, 0.0  ;;  %vm5760_vm8 = vcmp.lt.s32.totalorder %v2839_v13, %v2795_v7 }
 0x242   : > { %v1272_v18 = vmax.f32 %v5752_v23, %v1260_v34  ;;  %v1274_v52 = vmax.f32 %v5759_v0, %v1262_v28  ;;  %vm5761_vm5 = vcmp.ge.s32.totalorder %v2839_v13, %v2736_v63  ;;  %v5762_v38 = vmov 0 }
 0x243   : > { %vm4373_vm11 = vmand %vm5761_vm5, %vm5760_vm8  ;;  %vm5764_vm0 = vcmp.lt.s32.totalorder %v2804_v9, %v2795_v7  ;;  %vm5765_vm1 = vcmp.ge.s32.totalorder %v2804_v9, %v2736_v63  ;;  %v5766_v34 = vmov 0  ;;  %vm5768_vm4 = vcmp.lt.s32.totalorder %v2580_v33, %v2884_v17 }
 0x244   : > { %v5763_v38 = vsel %vm4373_vm11, 4294967295, %v5762_v38  ;;  %vm4383_vm10 = vmand %vm5765_vm1, %vm5764_vm0  ;;  %vm5769_vm14 = vcmp.ge.s32.totalorder %v2580_v33, %v2795_v7  ;;  %v5770_v0 = vmov 0  ;;  %v922_v63 = vrot.slane %v921_v15, 2 }
 0x245   : > { %v5767_v34 = vsel %vm4383_vm10, 4294967295, %v5766_v34  ;;  %vm4393_vm5 = vmand %vm5769_vm14, %vm5768_vm4  ;;  %v1044_v55 = vrot.slane %v1043_v25, 2  ;;  %v1270_v28 = vsel %vm4149_vm7, %v3924_v1, 0.0  ;;  %v1275_v53 = vmax.f32 %v1271_v46, %v1263_v5 }
 0x246   : > { %v5771_v0 = vsel %vm4393_vm5, 4294967295, %v5770_v0  ;;  %vm5773_vm0 = vcmp.lt.s32.totalorder %v2601_v42, %v2884_v17  ;;  %vm5774_vm14 = vcmp.ge.s32.totalorder %v2601_v42, %v2795_v7  ;;  %v5775_v41 = vmov 0 }
 0x247   : > { %5772 = vst [vmem:[#allocation33_spill] sm:$0xff] %v5771_v0  ;;  %vm4410_vm1 = vmand %vm5774_vm14, %vm5773_vm0  ;;  %v1165_v46 = vmax.f32 %v1163_v30, %v1164_v59  ;;  %v1276_v62 = vmax.f32 %v1272_v18, %v1264_v43  ;;  %v1277_v5 = vmax.f32 %v1273_v35, %v1265_v32  ;;  %v1278_v23 = vmax.f32 %v1274_v52, %v1266_v22 }
 0x248   : > { %v5776_v41 = vsel %vm4410_vm1, 4294967295, %v5775_v41  ;;  %vm5777_vm0 = vcmp.lt.s32.totalorder %v2593_v39, %v2884_v17  ;;  %vm5778_vm14 = vcmp.ge.s32.totalorder %v2593_v39, %v2795_v7  ;;  %v5779_v20 = vmov 0 }
 0x249   : > { %vm4428_vm4 = vmand %vm5778_vm14, %vm5777_vm0  ;;  %vm5781_vm8 = vcmp.lt.s32.totalorder %v2629_v47, %v2884_v17  ;;  %vm5782_vm11 = vcmp.ge.s32.totalorder %v2629_v47, %v2795_v7  ;;  %v923_v35 = vmax.f32 %v921_v15, %v922_v63  ;;  %v1045_v32 = vmax.f32 %v1043_v25, %v1044_v55 }
 0x24a   : > { %v5780_v20 = vsel %vm4428_vm4, 4294967295, %v5779_v20  ;;  %vm4438_vm7 = vmand %vm5782_vm11, %vm5781_vm8  ;;  %v1279_v30 = vmax.f32 %v1275_v53, %v1267_v14  ;;  %vm5785_vm8 = vcmp.lt.s32.totalorder %v2621_v45, %v2884_v17  ;;  %vm5786_vm10 = vcmp.ge.s32.totalorder %v2621_v45, %v2795_v7 }
 0x24b   : > { %vm4461_vm0 = vmand %vm5786_vm10, %vm5785_vm8  ;;  %v5787_v22 = vmov 0  ;;  %v1166_v14 = vrot.slane %v1165_v46, 2  ;;  %v1280_v15 = vmax.f32 %v1276_v62, %v1268_v36  ;;  %v1281_v25 = vmax.f32 %v1277_v5, %v1269_v11 }
 0x24c   : > { %v5788_v22 = vsel %vm4461_vm0, 4294967295, %v5787_v22  ;;  %v1282_v59 = vmax.f32 %v1278_v23, %v1270_v28  ;;  %vm5789_vm10 = vcmp.lt.s32.totalorder %v2669_v51, %v2884_v17  ;;  %vm5790_vm8 = vcmp.ge.s32.totalorder %v2669_v51, %v2795_v7 }
 0x24d   : > { %vm4482_vm11 = vmand %vm5790_vm8, %vm5789_vm10  ;;  %v5791_v18 = vmov 0  ;;  %vm5793_vm4 = vcmp.lt.s32.totalorder %v2659_v49, %v2884_v17  ;;  %vm5794_vm14 = vcmp.ge.s32.totalorder %v2659_v49, %v2795_v7  ;;  %vm5797_vm5 = vcmp.lt.s32.totalorder %v2711_v60, %v2884_v17 }
 0x24e   : > { %v5792_v18 = vsel %vm4482_vm11, 4294967295, %v5791_v18  ;;  %vm4492_vm1 = vmand %vm5794_vm14, %vm5793_vm4  ;;  %vm5798_vm0 = vcmp.ge.s32.totalorder %v2711_v60, %v2795_v7  ;;  %v924_v63 = vrot.slane %v923_v35, 1  ;;  %v1046_v55 = vrot.slane %v1045_v32, 1 }
 0x24f   : > { %vm4502_vm10 = vmand %vm5798_vm0, %vm5797_vm5  ;;  %v1381_v28 = vsel %vm4185_vm12, %v5687_v54, 0.0  ;;  %v1382_v53 = vsel %vm4195_vm3, %v5699_v26, 0.0  ;;  %vm5801_vm5 = vcmp.lt.s32.totalorder %v2693_v57, %v2884_v17  ;;  %vm5802_vm0 = vcmp.ge.s32.totalorder %v2693_v57, %v2795_v7 }
 0x250   : > { %vm4526_vm11 = vmand %vm5802_vm0, %vm5801_vm5  ;;  %vm5805_vm14 = vcmp.lt.s32.totalorder %v2766_v2, %v2884_v17  ;;  %vm5806_vm12 = vcmp.ge.s32.totalorder %v2766_v2, %v2795_v7  ;;  %v1167_v12 = vmax.f32 %v1165_v46, %v1166_v14  ;;  %v1283_v5 = vmax.f32 %v1279_v30, %v1280_v15 }
 0x251   : > { %vm4536_vm8 = vmand %vm5806_vm12, %vm5805_vm14  ;;  %v1284_v23 = vmax.f32 %v1281_v25, %v1282_v59  ;;  %v1383_v52 = vsel %vm4225_vm2, %v5701_v19, 0.0  ;;  %vm5809_vm5 = vcmp.lt.s32.totalorder %v2769_v3, %v2884_v17  ;;  %vm5810_vm14 = vcmp.ge.s32.totalorder %v2769_v3, %v2795_v7 }
 0x252   : > { %vm4553_vm0 = vmand %vm5810_vm14, %vm5809_vm5  ;;  %v5811_v0 = vmov 0  ;;  %vm5814_vm12 = vcmp.lt.s32.totalorder %v2801_v8, %v2884_v17  ;;  %vm5815_vm3 = vcmp.ge.s32.totalorder %v2801_v8, %v2795_v7  ;;  %v5816_v46 = vmov 0 }
 0x253   : > { %v5812_v0 = vsel %vm4553_vm0, 4294967295, %v5811_v0  ;;  %vm4563_vm4 = vmand %vm5815_vm3, %vm5814_vm12  ;;  %v925_v27 = vmax.f32 %v923_v35, %v924_v63  ;;  %v1047_v30 = vmax.f32 %v1045_v32, %v1046_v55  ;;  %v1384_v14 = vsel %vm4249_vm9, %v3363_v58, 0.0  ;;  %v5831_v63 = vld [vmem:[#allocation39_spill] sm:$0xff]  ;;  %v5832_v55 = vld [vmem:[#allocation37_spill] sm:$0xff] }
 0x254   : > { %5813 = vst [vmem:[#allocation32_spill] sm:$0xff] %v5812_v0  ;;  %v5817_v46 = vsel %vm4563_vm4, 4294967295, %v5816_v46  ;;  %vm5819_vm14 = vnez %v5716_v24  ;;  %vm5820_vm3 = vcmp.lt.s32.totalorder %v2772_v4, %v2884_v17  ;;  %vm5821_vm12 = vcmp.ge.s32.totalorder %v2772_v4, %v2795_v7  ;;  %v5837_v4 = vld [vmem:[#allocation23_spill] sm:$0xff] }
 0x255   : > { %5818 = vst [vmem:[#allocation34_spill] sm:$0xff] %v5817_v46  ;;  %v1385_v15 = vsel %vm5819_vm14, %v3555_v31, 0.0  ;;  %vm4583_vm2 = vmand %vm5821_vm12, %vm5820_vm3  ;;  %v5822_v25 = vmov 0  ;;  %v1168_v29 = vrot.slane %v1167_v12, 1  ;;  %v1285_v35 = vmax.f32 %v1283_v5, %v1284_v23  ;;  %v5834_v23 = vld [vmem:[#allocation38_spill] sm:$0xff] }
 0x256   : > { %v5823_v25 = vsel %vm4583_vm2, 4294967295, %v5822_v25  ;;  %v1386_v24 = vsel %vm4279_vm6, %v5671_v16, 0.0  ;;  %v1387_v32 = vsel %vm4289_vm15, %v3709_v37, 0.0  ;;  %vm5825_vm14 = vcmp.lt.s32.totalorder %v2839_v13, %v2884_v17  ;;  %926 = vst [vmem:[%s4613_s22] sm:$0x1] %v925_v27  ;;  %1048 = vst [vmem:[%s4613_s22 + $0x1] sm:$0x1] %v1047_v30 }
 0x257   : > { %5824 = vst [vmem:[#allocation40_spill] sm:$0xff] %v5823_v25  ;;  %vm5826_vm3 = vcmp.ge.s32.totalorder %v2839_v13, %v2795_v7  ;;  %v5827_v59 = vmov 0  ;;  %v1388_v21 = vsel %vm4312_vm13, %v3664_v44, 0.0  ;;  %vm5833_vm15 = vnez %v5832_v55  ;;  %v5839_v25 = vld [vmem:[#allocation22_spill] sm:$0xff]  ;;  %v5850_v55 = vld [vmem:[#allocation31_spill] sm:$0xff] }
 0x258   : > { %vm4603_vm12 = vmand %vm5826_vm3, %vm5825_vm14  ;;  %v1389_v5 = vsel %vm5833_vm15, %v5831_v63, 0.0  ;;  %vm5838_vm3 = vnez %v5837_v4  ;;  %vm5841_vm5 = vcmp.lt.s32.totalorder %v2804_v9, %v2884_v17  ;;  %vm5842_vm6 = vcmp.ge.s32.totalorder %v2804_v9, %v2795_v7  ;;  %v5846_v30 = vld [vmem:[#allocation26_spill] sm:$0xff] }
 0x259   : > { %v5828_v59 = vsel %vm4603_vm12, 4294967295, %v5827_v59  ;;  %v5840_v46 = vsel %vm5838_vm3, %v5839_v25, 0.0  ;;  %vm4636_vm13 = vmand %vm5842_vm6, %vm5841_vm5  ;;  %v5843_v27 = vmov 0  ;;  %v1169_v4 = vmax.f32 %v1167_v12, %v1168_v29 }
 0x25a   : > { %5829 = vst [vmem:[#allocation19_spill] sm:$0xff] %v5828_v59  ;;  %v5835_v59 = vld [vmem:[#allocation35_spill] sm:$0xff]  ;;  %v1393_v0 = vmax.f32 %v5840_v46, %v1381_v28  ;;  %v5844_v27 = vsel %vm4636_vm13, 4294967295, %v5843_v27  ;;  %v5847_v28 = vld [vmem:[#allocation24_spill] sm:$0xff]  ;;  %vm5851_vm9 = vnez %v5850_v55  ;;  %vm5853_vm5 = vcmp.lt.s32.totalorder %v5747_v10, %v5748_v61 }
 0x25b   : > { %vm5836_vm14 = vnez %v5835_v59  ;;  %5845 = vst [vmem:[#allocation12_spill] sm:$0xff] %v5844_v27  ;;  %v1286_v59 = vrot.slane %v1285_v35, 4  ;;  %vm5848_vm3 = vnez %v5847_v28  ;;  %v5852_v7 = vsel %vm5851_vm9, %v5755_v50, 0.0  ;;  %v5864_v28 = vld [vmem:[#allocation42_spill] sm:$0xff]  ;;  %1170 = vst [vmem:[%s4613_s22 + $0x2] sm:$0x1] %v1169_v4 }
 0x25c   : > { %v1390_v13 = vsel %vm5836_vm14, %v5834_v23, 0.0  ;;  %v5849_v46 = vsel %vm5848_vm3, %v5751_v40, 0.0  ;;  %v1395_v9 = vmax.f32 %v5852_v7, %v1383_v52  ;;  %vm5854_vm6 = vcmp.ge.s32.totalorder %v5747_v10, %v2884_v17  ;;  %v5861_v52 = vld [vmem:[#allocation41_spill] sm:$0xff] }
 0x25d   : > { %v1394_v48 = vmax.f32 %v5849_v46, %v1382_v53  ;;  %vm4658_vm15 = vmand %vm5854_vm6, %vm5853_vm5  ;;  %v5855_v27 = vmov 0  ;;  %vm5857_vm14 = vcmp.lt.s32.totalorder %v2580_v33, %v5748_v61  ;;  %vm5858_vm3 = vcmp.ge.s32.totalorder %v2580_v33, %v2884_v17 }
 0x25e   : > { %v5856_v27 = vsel %vm4658_vm15, 4294967295, %v5855_v27  ;;  %vm4668_vm13 = vmand %vm5858_vm3, %vm5857_vm14  ;;  %v5859_v53 = vmov 0  ;;  %vm5862_vm5 = vnez %v5763_v38  ;;  %vm5863_vm6 = vnez %v5767_v34 }
 0x25f   : > { %v5860_v53 = vsel %vm4668_vm13, 4294967295, %v5859_v53  ;;  %v1391_v12 = vsel %vm5862_vm5, %v5861_v52, 0.0  ;;  %v1392_v29 = vsel %vm5863_vm6, %v3924_v1, 0.0  ;;  %vm5865_vm15 = vnez %v5864_v28 }
 0x260   : > { %v5866_v46 = vsel %vm5865_vm15, %v3082_v56, 0.0  ;;  %v1397_v7 = vmax.f32 %v1393_v0, %v1385_v15  ;;  %vm5867_vm14 = vcmp.lt.s32.totalorder %v2601_v42, %v5748_v61  ;;  %vm5868_vm3 = vcmp.ge.s32.totalorder %v2601_v42, %v2884_v17 }
 0x261   : > { %v1396_v55 = vmax.f32 %v5866_v46, %v1384_v14  ;;  %vm4692_vm9 = vmand %vm5868_vm3, %vm5867_vm14  ;;  %v5869_v33 = vmov 0  ;;  %v1287_v38 = vmax.f32 %v1285_v35, %v1286_v59  ;;  %v1398_v34 = vmax.f32 %v1394_v48, %v1386_v24 }
 0x262   : > { %v5870_v33 = vsel %vm4692_vm9, 4294967295, %v5869_v33  ;;  %v1399_v0 = vmax.f32 %v1395_v9, %v1387_v32  ;;  %vm5871_vm15 = vnez %v5776_v41  ;;  %vm5872_vm14 = vcmp.lt.s32.totalorder %v2593_v39, %v5748_v61 }
 0x263   : > { %v1501_v14 = vsel %vm5871_vm15, %v5755_v50, 0.0  ;;  %vm5873_vm3 = vcmp.ge.s32.totalorder %v2593_v39, %v2884_v17  ;;  %vm5876_vm5 = vcmp.lt.s32.totalorder %v2629_v47, %v5748_v61  ;;  %vm5877_vm6 = vcmp.ge.s32.totalorder %v2629_v47, %v2884_v17 }
 0x264   : > { %vm4710_vm12 = vmand %vm5873_vm3, %vm5872_vm14  ;;  %v5878_v9 = vmov 0  ;;  %v1400_v41 = vmax.f32 %v1396_v55, %v1388_v21  ;;  %v1401_v35 = vmax.f32 %v1397_v7, %v1389_v5  ;;  %vm5880_vm14 = vnez %v5780_v20 }
 0x265   : > { %vm4720_vm9 = vmand %vm5877_vm6, %vm5876_vm5  ;;  %v1502_v24 = vsel %vm5880_vm14, %v3082_v56, 0.0  ;;  %v1503_v32 = vsel %vm4438_vm7, %v5687_v54, 0.0  ;;  %vm5881_vm5 = vcmp.lt.s32.totalorder %v2621_v45, %v5748_v61  ;;  %vm5882_vm6 = vcmp.ge.s32.totalorder %v2621_v45, %v2884_v17 }
 0x266   : > { %v5879_v9 = vsel %vm4720_vm9, 4294967295, %v5878_v9  ;;  %vm4740_vm3 = vmand %vm5882_vm6, %vm5881_vm5  ;;  %v5883_v4 = vmov 0  ;;  %vm5885_vm15 = vcmp.lt.s32.totalorder %v2669_v51, %v5748_v61  ;;  %vm5886_vm14 = vcmp.ge.s32.totalorder %v2669_v51, %v2884_v17  ;;  %v5920_v51 = vld [vmem:[#allocation16_spill] sm:$0xff] }
 0x267   : > { %v5884_v4 = vsel %vm4740_vm3, 4294967295, %v5883_v4  ;;  %vm4750_vm13 = vmand %vm5886_vm14, %vm5885_vm15  ;;  %v5887_v20 = vmov 0  ;;  %vm5889_vm7 = vcmp.lt.s32.totalorder %v2659_v49, %v5748_v61  ;;  %vm5890_vm9 = vcmp.ge.s32.totalorder %v2659_v49, %v2884_v17  ;;  %v5928_v49 = vld [vmem:[#allocation33_spill] sm:$0xff] }
 0x268   : > { %v5888_v20 = vsel %vm4750_vm13, 4294967295, %v5887_v20  ;;  %vm4760_vm5 = vmand %vm5890_vm9, %vm5889_vm7  ;;  %v5891_v43 = vmov 0  ;;  %v1288_v21 = vrot.slane %v1287_v38, 2  ;;  %v1402_v5 = vmax.f32 %v1398_v34, %v1390_v13  ;;  %v5978_v13 = vld [vmem:[#allocation39_spill] sm:$0xff] }
 0x269   : > { %v5892_v43 = vsel %vm4760_vm5, 4294967295, %v5891_v43  ;;  %v1403_v59 = vmax.f32 %v1399_v0, %v1391_v12  ;;  %vm5893_vm15 = vnez %v5788_v22  ;;  %vm5894_vm14 = vcmp.lt.s32.totalorder %v2711_v60, %v5748_v61 }
 0x26a   : > { %v1504_v48 = vsel %vm5893_vm15, %v5699_v26, 0.0  ;;  %vm5895_vm9 = vcmp.ge.s32.totalorder %v2711_v60, %v2884_v17  ;;  %vm5898_vm6 = vcmp.lt.s32.totalorder %v2693_v57, %v5748_v61  ;;  %vm5899_vm3 = vcmp.ge.s32.totalorder %v2693_v57, %v2884_v17 }
 0x26b   : > { %vm4777_vm7 = vmand %vm5895_vm9, %vm5894_vm14  ;;  %v1404_v22 = vmax.f32 %v1400_v41, %v1392_v29  ;;  %vm5902_vm14 = vnez %v5792_v18  ;;  %v1506_v46 = vsel %vm4492_vm1, %v3363_v58, 0.0  ;;  %v1507_v55 = vsel %vm4502_vm10, %v3555_v31, 0.0 }
 0x26c   : > { %vm4787_vm5 = vmand %vm5899_vm3, %vm5898_vm6  ;;  %v1505_v12 = vsel %vm5902_vm14, %v5701_v19, 0.0  ;;  %vm5903_vm3 = vcmp.lt.s32.totalorder %v2766_v2, %v5748_v61  ;;  %vm5904_vm6 = vcmp.ge.s32.totalorder %v2766_v2, %v2884_v17  ;;  %vm5907_vm14 = vcmp.lt.s32.totalorder %v2769_v3, %v5748_v61 }
 0x26d   : > { %vm4810_vm9 = vmand %vm5904_vm6, %vm5903_vm3  ;;  %vm5908_vm1 = vcmp.ge.s32.totalorder %v2769_v3, %v2884_v17  ;;  %v5909_v18 = vmov 0  ;;  %v1289_v36 = vmax.f32 %v1287_v38, %v1288_v21  ;;  %v1405_v11 = vmax.f32 %v1401_v35, %v1402_v5 }
 0x26e   : > { %vm4820_vm15 = vmand %vm5908_vm1, %vm5907_vm14  ;;  %v1508_v7 = vsel %vm4526_vm11, %v5671_v16, 0.0  ;;  %v1509_v34 = vsel %vm4536_vm8, %v3709_v37, 0.0  ;;  %vm5912_vm3 = vcmp.lt.s32.totalorder %v2801_v8, %v5748_v61  ;;  %vm5913_vm6 = vcmp.ge.s32.totalorder %v2801_v8, %v2884_v17 }
 0x26f   : > { %v5910_v18 = vsel %vm4820_vm15, 4294967295, %v5909_v18  ;;  %vm4840_vm14 = vmand %vm5913_vm6, %vm5912_vm3  ;;  %v5914_v0 = vmov 0  ;;  %v1406_v62 = vmax.f32 %v1403_v59, %v1404_v22  ;;  %v1510_v38 = vsel %vm4553_vm0, %v3664_v44, 0.0 }
 0x270   : > { %5911 = vst [vmem:[#allocation25_spill] sm:$0xff] %v5910_v18  ;;  %v5915_v0 = vsel %vm4840_vm14, 4294967295, %v5914_v0  ;;  %v1511_v35 = vsel %vm4563_vm4, %v5831_v63, 0.0  ;;  %v1512_v5 = vsel %vm4583_vm2, %v5834_v23, 0.0  ;;  %vm5921_vm8 = vcmp.lt.s32.totalorder %v5920_v51, %v5748_v61  ;;  %v5931_v18 = vld [vmem:[#allocation18_spill] sm:$0xff] }
 0x271   : > { %5916 = vst [vmem:[#allocation21_spill] sm:$0xff] %v5915_v0  ;;  %vm5922_vm3 = vcmp.ge.s32.totalorder %v5920_v51, %v2884_v17  ;;  %v1290_v22 = vrot.slane %v1289_v36, 1  ;;  %vm5926_vm1 = vnez %v5925_v6  ;;  %vm5929_vm2 = vnez %v5928_v49  ;;  %v5940_v6 = vld [vmem:[#allocation17_spill] sm:$0xff] }
 0x272   : > { %vm4863_vm6 = vmand %vm5922_vm3, %vm5921_vm8  ;;  %v5927_v41 = vsel %vm5926_vm1, %v5839_v25, 0.0  ;;  %v5930_v23 = vsel %vm5929_vm2, %v5751_v40, 0.0  ;;  %v1517_v63 = vmax.f32 %v1501_v14, %v1505_v12  ;;  %vm5932_vm8 = vcmp.lt.s32.totalorder %v5931_v18, %v5748_v61 }
 0x273   : > { %v1515_v21 = vmax.f32 %v5927_v41, %v1503_v32  ;;  %v1516_v0 = vmax.f32 %v5930_v23, %v1504_v48  ;;  %vm5933_vm3 = vcmp.ge.s32.totalorder %v5931_v18, %v2884_v17  ;;  %v1407_v49 = vmax.f32 %v1405_v11, %v1406_v62  ;;  %v5936_v23 = vld [vmem:[#allocation19_spill] sm:$0xff]  ;;  %v5938_v32 = vld [vmem:[#allocation12_spill] sm:$0xff] }
 0x274   : > { %vm4885_vm0 = vmand %vm5933_vm3, %vm5932_vm8  ;;  %vm5937_vm2 = vnez %v5936_v23  ;;  %vm5939_vm11 = vnez %v5938_v32  ;;  %v1518_v12 = vmax.f32 %v1502_v24, %v1506_v46  ;;  %vm5941_vm8 = vcmp.lt.s32.totalorder %v5940_v6, %v5748_v61 }
 0x275   : > { %v1513_v14 = vsel %vm5937_vm2, %v5861_v52, 0.0  ;;  %v1514_v48 = vsel %vm5939_vm11, %v3924_v1, 0.0  ;;  %vm5942_vm3 = vcmp.ge.s32.totalorder %v5940_v6, %v2884_v17  ;;  %v1291_v11 = vmax.f32 %v1289_v36, %v1290_v22 }
 0x276   : > { %vm4905_vm1 = vmand %vm5942_vm3, %vm5941_vm8  ;;  %v1519_v62 = vmax.f32 %v1515_v21, %v1507_v55  ;;  %v1520_v24 = vmax.f32 %v1516_v0, %v1508_v7  ;;  %v1521_v46 = vmax.f32 %v1517_v63, %v1509_v34  ;;  %vm5945_vm3 = vcmp.lt.s32.totalorder %v5747_v10, %v5846_v30 }
 0x277   : > { %vm5946_vm4 = vcmp.ge.s32.totalorder %v5747_v10, %v5748_v61  ;;  %v5947_v17 = vmov 0  ;;  %v1408_v36 = vrot.slane %v1407_v49, 4  ;;  %v1522_v55 = vmax.f32 %v1518_v12, %v1510_v38  ;;  %v5951_v10 = vld [vmem:[#allocation11_spill] sm:$0xff]  ;;  %1292 = vst [vmem:[%s4613_s22 + $0x3] sm:$0x1] %v1291_v11 }
 0x278   : > { %vm4923_vm10 = vmand %vm5946_vm4, %vm5945_vm3  ;;  %vm5949_vm2 = vnez %v5856_v27  ;;  %vm5950_vm11 = vnez %v5860_v53  ;;  %vm5952_vm4 = vcmp.lt.s32.totalorder %v5951_v10, %v5846_v30  ;;  %vm5953_vm3 = vcmp.ge.s32.totalorder %v5951_v10, %v5748_v61 }
 0x279   : > { %v5948_v17 = vsel %vm4923_vm10, 4294967295, %v5947_v17  ;;  %v1621_v63 = vsel %vm5949_vm2, %v5839_v25, 0.0  ;;  %v1622_v7 = vsel %vm5950_vm11, %v5751_v40, 0.0  ;;  %vm4943_vm10 = vmand %vm5953_vm3, %vm5952_vm4  ;;  %v1523_v27 = vmax.f32 %v1519_v62, %v1511_v35  ;;  %v5980_v62 = vld [vmem:[#allocation38_spill] sm:$0xff] }
 0x27a   : > { %v1524_v53 = vmax.f32 %v1520_v24, %v1512_v5  ;;  %v1525_v0 = vmax.f32 %v1521_v46, %v1513_v14  ;;  %vm5956_vm2 = vnez %v5870_v33  ;;  %vm5957_vm4 = vcmp.lt.s32.totalorder %v2601_v42, %v5846_v30  ;;  %v5981_v24 = vld [vmem:[#allocation14_spill] sm:$0xff] }
 0x27b   : > { %v1623_v38 = vsel %vm5956_vm2, %v5755_v50, 0.0  ;;  %vm5958_vm3 = vcmp.ge.s32.totalorder %v2601_v42, %v5748_v61  ;;  %v5959_v35 = vmov 0  ;;  %v1409_v5 = vmax.f32 %v1407_v49, %v1408_v36 }
 0x27c   : > { %vm4961_vm13 = vmand %vm5958_vm3, %vm5957_vm4  ;;  %v1526_v22 = vmax.f32 %v1522_v55, %v1514_v48  ;;  %v1624_v33 = vsel %vm4710_vm12, %v3082_v56, 0.0  ;;  %vm5961_vm2 = vnez %v5879_v9  ;;  %vm5962_vm4 = vcmp.lt.s32.totalorder %v2593_v39, %v5846_v30 }
 0x27d   : > { %v5960_v35 = vsel %vm4961_vm13, 4294967295, %v5959_v35  ;;  %v1625_v21 = vsel %vm5961_vm2, %v5687_v54, 0.0  ;;  %vm5963_vm3 = vcmp.ge.s32.totalorder %v2593_v39, %v5748_v61  ;;  %v5964_v42 = vmov 0 }
 0x27e   : > { %vm4981_vm13 = vmand %vm5963_vm3, %vm5962_vm4  ;;  %v1527_v15 = vmax.f32 %v1523_v27, %v1524_v53  ;;  %vm5966_vm12 = vnez %v5884_v4  ;;  %vm5967_vm2 = vnez %v5888_v20  ;;  %vm5968_vm11 = vnez %v5892_v43  ;;  %v5986_v27 = vld [vmem:[#allocation13_spill] sm:$0xff] }
 0x27f   : > { %v5965_v42 = vsel %vm4981_vm13, 4294967295, %v5964_v42  ;;  %v1626_v9 = vsel %vm5966_vm12, %v5699_v26, 0.0  ;;  %v1627_v49 = vsel %vm5967_vm2, %v5701_v19, 0.0  ;;  %v1628_v23 = vsel %vm5968_vm11, %v3363_v58, 0.0 }
 0x280   : > { %vm1694_vm4 = vcmp.lt.s32.totalorder %v5940_v6, %v5846_v30  ;;  %vm5969_vm3 = vcmp.lt.s32.totalorder %v2629_v47, %v5846_v30  ;;  %vm5970_vm12 = vcmp.ge.s32.totalorder %v2629_v47, %v5748_v61  ;;  %v1410_v4 = vrot.slane %v1409_v5, 2 }
 0x281   : > { %vm5004_vm13 = vmand %vm5970_vm12, %vm5969_vm3  ;;  %v1528_v20 = vmax.f32 %v1525_v0, %v1526_v22  ;;  %v1629_v43 = vsel %vm4777_vm7, %v3555_v31, 0.0  ;;  %v1630_v14 = vsel %vm4787_vm5, %v5671_v16, 0.0  ;;  %vm5973_vm11 = vcmp.lt.s32.totalorder %v2621_v45, %v5846_v30 }
 0x282   : > { %vm5974_vm2 = vcmp.ge.s32.totalorder %v2621_v45, %v5748_v61  ;;  %v1631_v32 = vsel %vm4810_vm9, %v3709_v37, 0.0  ;;  %v1632_v48 = vsel %vm4820_vm15, %v3664_v44, 0.0  ;;  %v1633_v11 = vsel %vm4840_vm14, %v5978_v13, 0.0 }
 0x283   : > { %vm5020_vm3 = vmand %vm5974_vm2, %vm5973_vm11  ;;  %v1634_v45 = vsel %vm4863_vm6, %v5980_v62, 0.0  ;;  %vm5982_vm5 = vcmp.lt.s32.totalorder %v5981_v24, %v5846_v30  ;;  %vm5983_vm7 = vcmp.ge.s32.totalorder %v5981_v24, %v5748_v61  ;;  %v1411_v46 = vmax.f32 %v1409_v5, %v1410_v4  ;;  %v5991_v5 = vld [vmem:[#allocation15_spill] sm:$0xff] }
 0x284   : > { %vm5042_vm12 = vmand %vm5983_vm7, %vm5982_vm5  ;;  %v1529_v36 = vmax.f32 %v1527_v15, %v1528_v20  ;;  %v1637_v55 = vmax.f32 %v1621_v63, %v1625_v21  ;;  %v1638_v10 = vmax.f32 %v1622_v7, %v1626_v9  ;;  %vm5987_vm15 = vcmp.lt.s32.totalorder %v5986_v27, %v5846_v30 }
 0x285   : > { %vm5988_vm9 = vcmp.ge.s32.totalorder %v5986_v27, %v5748_v61  ;;  %v1635_v53 = vsel %vm4885_vm0, %v5861_v52, 0.0  ;;  %v1636_v0 = vsel %vm4905_vm1, %v3924_v1, 0.0  ;;  %v1639_v63 = vmax.f32 %v1623_v38, %v1627_v49 }
 0x286   : > { %vm5052_vm14 = vmand %vm5988_vm9, %vm5987_vm15  ;;  %v1640_v7 = vmax.f32 %v1624_v33, %v1628_v23  ;;  %vm5992_vm6 = vcmp.lt.s32.totalorder %v5991_v5, %v5846_v30  ;;  %vm5993_vm11 = vcmp.ge.s32.totalorder %v5991_v5, %v5748_v61  ;;  %v1412_v21 = vrot.slane %v1411_v46, 1 }
 0x287   : > { %vm5068_vm2 = vmand %vm5993_vm11, %vm5992_vm6  ;;  %v1530_v15 = vrot.slane %v1529_v36, 4  ;;  %v1641_v60 = vmax.f32 %v1637_v55, %v1629_v43  ;;  %v1642_v9 = vmax.f32 %v1638_v10, %v1630_v14  ;;  %vm5996_vm0 = vcmp.lt.s32.totalorder %v2693_v57, %v5846_v30 }
 0x288   : > { %vm5997_vm1 = vcmp.ge.s32.totalorder %v2693_v57, %v5748_v61  ;;  %v1643_v38 = vmax.f32 %v1639_v63, %v1631_v32  ;;  %v1644_v33 = vmax.f32 %v1640_v7, %v1632_v48  ;;  %vm6000_vm7 = vcmp.lt.s32.totalorder %v2766_v2, %v5846_v30 }
 0x289   : > { %vm5078_vm5 = vmand %vm5997_vm1, %vm5996_vm0  ;;  %vm6001_vm15 = vcmp.ge.s32.totalorder %v2766_v2, %v5748_v61  ;;  %vm6004_vm6 = vnez %v5948_v17  ;;  %v1744_v23 = vsel %vm4943_vm10, %v5751_v40, 0.0  ;;  %v1413_v4 = vmax.f32 %v1411_v46, %v1412_v21 }
 0x28a   : > { %vm5088_vm9 = vmand %vm6001_vm15, %vm6000_vm7  ;;  %v1743_v57 = vsel %vm6004_vm6, %v5839_v25, 0.0  ;;  %v1531_v20 = vmax.f32 %v1529_v36, %v1530_v15  ;;  %v1645_v43 = vmax.f32 %v1641_v60, %v1633_v11  ;;  %v1646_v14 = vmax.f32 %v1642_v9, %v1634_v45 }
 0x28b   : > { %vm6005_vm11 = vcmp.lt.s32.totalorder %v2769_v3, %v5846_v30  ;;  %vm6006_vm0 = vcmp.ge.s32.totalorder %v2769_v3, %v5748_v61  ;;  %v1647_v17 = vmax.f32 %v1643_v38, %v1635_v53  ;;  %v1648_v25 = vmax.f32 %v1644_v33, %v1636_v0  ;;  %1414 = vst [vmem:[%s4613_s22 + $0x4] sm:$0x1] %v1413_v4 }
 0x28c   : > { %vm5104_vm1 = vmand %vm6006_vm0, %vm6005_vm11  ;;  %vm6009_vm7 = vcmp.lt.s32.totalorder %v2801_v8, %v5846_v30  ;;  %vm6010_vm10 = vcmp.ge.s32.totalorder %v2801_v8, %v5748_v61  ;;  %vm6013_vm6 = vnez %v5960_v35  ;;  %vm6014_vm11 = vnez %v5965_v42 }
 0x28d   : > { %vm5114_vm15 = vmand %vm6010_vm10, %vm6009_vm7  ;;  %v1745_v3 = vsel %vm6013_vm6, %v5755_v50, 0.0  ;;  %v1746_v34 = vsel %vm6014_vm11, %v3082_v56, 0.0  ;;  %v1532_v32 = vrot.slane %v1531_v20, 2  ;;  %v1649_v28 = vmax.f32 %v1645_v43, %v1646_v14 }
 0x28e   : > { %vm6015_vm0 = vcmp.lt.s32.totalorder %v5920_v51, %v5846_v30  ;;  %vm6016_vm7 = vcmp.ge.s32.totalorder %v5920_v51, %v5748_v61  ;;  %v1747_v50 = vsel %vm5004_vm13, %v5687_v54, 0.0  ;;  %v1748_v56 = vsel %vm5020_vm3, %v5699_v26, 0.0 }
 0x28f   : > { %vm5131_vm10 = vmand %vm6016_vm7, %vm6015_vm0  ;;  %v1650_v35 = vmax.f32 %v1647_v17, %v1648_v25  ;;  %vm6019_vm6 = vcmp.lt.s32.totalorder %v5931_v18, %v5846_v30  ;;  %vm6020_vm11 = vcmp.ge.s32.totalorder %v5931_v18, %v5748_v61  ;;  %v1749_v42 = vsel %vm5042_vm12, %v5701_v19, 0.0 }
 0x290   : > { %vm5147_vm8 = vmand %vm6020_vm11, %vm6019_vm6  ;;  %v1750_v54 = vsel %vm5052_vm14, %v3363_v58, 0.0  ;;  %v1751_v26 = vsel %vm5068_vm2, %v3555_v31, 0.0  ;;  %v1533_v39 = vmax.f32 %v1531_v20, %v1532_v32  ;;  %vm6023_vm13 = vcmp.ge.s32.totalorder %v5940_v6, %v5748_v61 }
 0x291   : > { %vm5166_vm3 = vmand %vm6023_vm13, %vm1694_vm4  ;;  %v1752_v19 = vsel %vm5078_vm5, %v5671_v16, 0.0  ;;  %v1753_v58 = vsel %vm5088_vm9, %v3709_v37, 0.0  ;;  %v1754_v31 = vsel %vm5104_vm1, %v3664_v44, 0.0  ;;  %v1651_v30 = vmax.f32 %v1649_v28, %v1650_v35 }
 0x292   : > { %v1755_v61 = vsel %vm5114_vm15, %v5978_v13, 0.0  ;;  %v1756_v6 = vsel %vm5131_vm10, %v5980_v62, 0.0  ;;  %v1759_v47 = vmax.f32 %v1743_v57, %v1747_v50  ;;  %v1534_v16 = vrot.slane %v1533_v39, 1 }
 0x293   : > { %v1760_v48 = vmax.f32 %v1744_v23, %v1748_v56  ;;  %v1761_v12 = vmax.f32 %v1745_v3, %v1749_v42  ;;  %v1762_v11 = vmax.f32 %v1746_v34, %v1750_v54  ;;  %v1652_v37 = vrot.slane %v1651_v30, 4 }
 0x294   : > { %v1757_v44 = vsel %vm5147_vm8, %v5861_v52, 0.0  ;;  %v1758_v45 = vsel %vm5166_vm3, %v3924_v1, 0.0  ;;  %v1763_v13 = vmax.f32 %v1759_v47, %v1751_v26  ;;  %v1535_v24 = vmax.f32 %v1533_v39, %v1534_v16 }
 0x295   : > { %v1764_v29 = vmax.f32 %v1760_v48, %v1752_v19  ;;  %v1765_v46 = vmax.f32 %v1761_v12, %v1753_v58  ;;  %v1766_v62 = vmax.f32 %v1762_v11, %v1754_v31  ;;  %v1653_v36 = vmax.f32 %v1651_v30, %v1652_v37 }
 0x296   : > { %v1767_v55 = vmax.f32 %v1763_v13, %v1755_v61  ;;  %1536 = vst [vmem:[%s4613_s22 + $0x5] sm:$0x1] %v1535_v24 }
 0x297   : > { %v1768_v10 = vmax.f32 %v1764_v29, %v1756_v6  ;;  %v1769_v27 = vmax.f32 %v1765_v46, %v1757_v44  ;;  %v1770_v59 = vmax.f32 %v1766_v62, %v1758_v45  ;;  %v1654_v53 = vrot.slane %v1653_v36, 2 }
 0x299   : > { %v1771_v52 = vmax.f32 %v1767_v55, %v1768_v10  ;;  %v1772_v0 = vmax.f32 %v1769_v27, %v1770_v59  ;;  %v1655_v1 = vmax.f32 %v1653_v36, %v1654_v53 }
 0x29b   : > { %v1773_v63 = vmax.f32 %v1771_v52, %v1772_v0  ;;  %v1656_v7 = vrot.slane %v1655_v1, 1 }
 0x29d   : > { %v1774_v5 = vrot.slane %v1773_v63, 4  ;;  %v1657_v22 = vmax.f32 %v1655_v1, %v1656_v7 }
 0x29f   : > { %v1775_v21 = vmax.f32 %v1773_v63, %v1774_v5  ;;  %1658 = vst [vmem:[%s4613_s22 + $0x6] sm:$0x1] %v1657_v22 }
 0x2a1   : > { %v1776_v15 = vrot.slane %v1775_v21, 2 }
 0x2a3   : > { %v1777_v60 = vmax.f32 %v1775_v21, %v1776_v15 }
 0x2a5   : > { %v1778_v9 = vrot.slane %v1777_v60, 1 }
 0x2a7   : > { %v1779_v41 = vmax.f32 %v1777_v60, %v1778_v9 }
 0x2a9   : > { %1780 = vst [vmem:[%s4613_s22 + $0x7] sm:$0x1] %v1779_v41 }
 0x2aa   : > { %2322 = shalt.err (!%p2319_p0)
}
 0x2ab   : > { %s2323_s13 = scalar_lea.hbm %s5199_s27, 128  ;;  %s2327_s21 = scalar_lea.hbm %s5250_s7, 512 }
 0x2ac   : > { %p2324_p1 = scmp.ne.s32.totalorder %s5199_s27, %s2323_s13  ;;  %p2328_p4 = scmp.lt.u32.totalorder %s5199_s27, %s5250_s7 }
 0x2ad   : > { %p2329_p5 = scmp.lt.u32.totalorder %s2327_s21, %s2323_s13  ;;  %p2331_p7 = scmp.lt.u32.totalorder %s2323_s13, %s5199_s27 }
 0x2ae   : > { %p2325_p2 = pnand %p2324_p1, %p2465_p10 }
 0x2af   : > { %p2330_p6 = por %p2329_p5, %p2328_p4 }
 0x2b0   : > { %p2326_p3 = pneg %p2325_p2 }
 0x2b1   : > { %p2332_p8 = por %p2331_p7, %p2330_p6 }
 0x2b3   : > { %p2333_p9 = pnand %p2332_p8, %p2326_p3 }
 0x2b5   : > { %2336 = shalt.err (!%p2333_p9)
}
 0x2b6   : > { %2223 = dma.vmem_to_hbm [thread:$0]  (%p2465_p10), %s5201_s23, 128, %s5199_s27, %s1787_s10  }
 0x2b7 PF: > { %p2233_p12 = scmp.ge.s32.totalorder %s2377_s8, 2  ;;  %s1828_s22 = sand.u32 1, %s2365_s29  }
 0x2b8   : > { %s1829_s25 = scalar_lea.sflag [#allocation5], %s1828_s22 }
 0x2b9   : > { %p2227_p13 = pnand %p2233_p12, %p2469_p11 }
 0x2bb   : > { %2356 = dma.done.wait (!%p2227_p13), %s1829_s25, 1024  }
 0x2bc   : > { %2358 = vsyncadd (!%p2227_p13), %s1829_s25, 4294966272  ;;  %s1838_s26 = scalar_lea.sflag [#allocation7], %s1828_s22 }
 0x2bd   : > { %2360 = dma.done.wait (!%p2227_p13), %s1838_s26, 128  }
 0x2be   : > { %2362 = vsyncadd (!%p2227_p13), %s1838_s26, 4294967168  ;;  %p27_p10 = scmp.ge.s32.totalorder %s2452_s11, 6   ;;  %s6026_s29 = smov %s2369_s0 }
 0x2bf   : > { %s6027_s0 = smov %s2373_s30  ;;  %s6028_s30 = smov %s2463_s14 }
 0x2c0   : > { %s6029_s8 = smov %s2452_s11  ;;  %29 = sbr.rel (!%p27_p10) target bundleno = 20 (0x14), region = 92 }
 0x2c7   :  { %1843 = vsyncpa [#allocation5], 1 }
 0x2c8   :  { %1845 = vsyncpa [#allocation5 + $0x1], 1 }
 0x2c9   :  { %1846 = vsyncpa [#allocation7], 1 }
 0x2ca   :  { %1848 = vsyncpa [#allocation7 + $0x1], 1 }

</bundles_post_ra>
